<compile_context>
chip_gen: v5e
topology: v5e:2x2
jax: 0.10.0
libtpu: 0.0.40
codegen_flags: <defaults>
</compile_context>

<pallas_src>
import jax
import jax.numpy as jnp
from jax.experimental import pallas as pl
from jax.experimental.pallas import tpu as pltpu

FEATURE_SIZE = 256
HIDDEN_CH = (128, 128, 64, 32)
IMAGE_CH = 3
_HIGHEST = jax.lax.Precision.HIGHEST


def _refine_kernel(patch_ref, g1_ref, g2_ref, g3_ref, g4_ref,
                   c1w_ref, c2w_ref, c3w_ref, c4w_ref, cfwT_ref, cfb_ref,
                   out_ref):
    """One (batch-block, HW-tile) step of the refinement head.

    patch_ref / out_ref : (Bb, 3, T) f32   lane-dense HW tile
    g_i                 : (Bb, Ci, 1) f32  linear_i(feature) + conv_i bias
    c1w                 : (128, 3)  f32    stage-1 weights (VPU broadcast-MACs)
    c2w/c3w/c4w         : (Cout, Cin) bf16 MXU weights (f32 accumulation)
    cfwT                : (32, 3)   f32    final conv weights, transposed (VPU)
    cfb                 : (3, 1)    f32    final conv bias
    """
    c1w = c1w_ref[...]
    c2w = c2w_ref[...]
    c3w = c3w_ref[...]
    c4w = c4w_ref[...]
    cfwT = cfwT_ref[...]
    cfb = cfb_ref[...]

    for b in range(patch_ref.shape[0]):          # static unroll (Bb == 1 for large images)
        x = patch_ref[b]                         # (3, T) f32

        # ---- stage 1 (K=3): keep off the MXU -- three VPU broadcast-MACs.
        p = (c1w[:, 0:1] * x[0:1, :]
             + c1w[:, 1:2] * x[1:2, :]
             + c1w[:, 2:3] * x[2:3, :]) + g1_ref[b]
        p = jnp.maximum(p, 0.0)                  # (128, T)

        # ---- stages 2-4: bf16 operands on the MXU, f32 accumulation.
        p = jnp.dot(c2w, p.astype(jnp.bfloat16),
                    preferred_element_type=jnp.float32) + g2_ref[b]
        p = jnp.maximum(p, 0.0)                  # (128, T)
        p = jnp.dot(c3w, p.astype(jnp.bfloat16),
                    preferred_element_type=jnp.float32) + g3_ref[b]
        p = jnp.maximum(p, 0.0)                  # (64, T)
        p = jnp.dot(c4w, p.astype(jnp.bfloat16),
                    preferred_element_type=jnp.float32) + g4_ref[b]
        p = jnp.maximum(p, 0.0)                  # (32, T)

        # ---- final conv (M=3, K=32): VPU multiply + sublane reduce per output
        # row, then residual + clamp(0, 1).  Avoids the last MXU pass.
        for c in range(IMAGE_CH):
            row = jnp.sum(cfwT[:, c:c + 1] * p, axis=0, keepdims=True)   # (1, T)
            row = row + cfb[c:c + 1, :] + x[c:c + 1, :]
            out_ref[b, c:c + 1, :] = jnp.clip(row, 0.0, 1.0)


def init_params(key):
    """Weights kept in PyTorch Conv2d layout (Cout, Cin); biases (Cout,)."""
    h = HIDDEN_CH
    shapes = {
        "l1w": (h[0], FEATURE_SIZE), "l1b": (h[0],),
        "c1w": (h[0], IMAGE_CH),     "c1b": (h[0],),
        "l2w": (h[1], h[0]),         "l2b": (h[1],),
        "c2w": (h[1], h[0]),         "c2b": (h[1],),
        "l3w": (h[2], h[1]),         "l3b": (h[2],),
        "c3w": (h[2], h[1]),         "c3b": (h[2],),
        "l4w": (h[3], h[2]),         "l4b": (h[3],),
        "c4w": (h[3], h[2]),         "c4b": (h[3],),
        "cfw": (IMAGE_CH, h[3]),     "cfb": (IMAGE_CH,),
    }
    params = {}
    names = sorted(shapes)
    keys = jax.random.split(key, len(names))
    for k_, name in zip(keys, names):
        shp = shapes[name]
        if len(shp) == 2:  # weight: normal / sqrt(fan_in)
            params[name] = (jax.random.normal(k_, shp, jnp.float32)
                            / jnp.sqrt(shp[1])).astype(jnp.float32)
        else:              # bias
            params[name] = (0.1 * jax.random.normal(k_, shp, jnp.float32)).astype(jnp.float32)
    return params


def _pick_tile_hw(hw):
    """Lane-aligned HW tile (<= 2048) and the padded HW it divides exactly."""
    hw128 = -(-hw // 128) * 128              # pad HW up to a lane multiple
    if hw128 <= 2048:
        return hw128, hw128                  # whole (padded) image in one tile
    for cand in (2048, 1024, 512, 256):
        if hw128 % cand == 0:
            return cand, hw128
    return 128, hw128                        # 128 always divides hw128


def _pick_batch_block(B, num_t, tile_hw):
    """Batch rows per grid step.  Only batch-block small images (single HW tile),
    and keep >= 2 grid steps so dual-TensorCore chips (v7x) get work on both."""
    if num_t > 1 or B <= 2:
        return 1
    target = max(1, 2048 // tile_hw)         # aim for ~2048 lane-columns per step
    best = 1
    for d in range(1, B // 2 + 1):
        if B % d == 0 and d <= target:
            best = d
    return best


@jax.jit
def net_forward(patch_nchw, feature, params):
    """patch_nchw: (B, 3, H, W) f32 in [0, 1];  feature: (B, 256) backbone output."""
    B, C, H, W = patch_nchw.shape
    assert C == IMAGE_CH
    HW = H * W

    # NCHW -> (B, C, HW): free reshape; pad HW to a lane multiple if needed.
    patch = patch_nchw.reshape(B, C, HW).astype(jnp.float32)
    tile_hw, hw_pad = _pick_tile_hw(HW)
    if hw_pad != HW:
        patch = jnp.pad(patch, ((0, 0), (0, 0), (0, hw_pad - HW)))
    num_t = hw_pad // tile_hw
    bb = _pick_batch_block(B, num_t, tile_hw)
    grid = (B // bb, num_t)

    # Feature MLP hoisted out of the kernel (M=1 matmuls would waste the MXU);
    # per-stage conv biases folded in: g_i = linear_i(feature) + conv_i.bias.
    f = feature.astype(jnp.float32)
    f = jnp.dot(f, params["l1w"].T, precision=_HIGHEST) + params["l1b"]
    g1 = (f + params["c1b"])[:, :, None]                  # (B, 128, 1)
    f = jnp.dot(f, params["l2w"].T, precision=_HIGHEST) + params["l2b"]
    g2 = (f + params["c2b"])[:, :, None]                  # (B, 128, 1)
    f = jnp.dot(f, params["l3w"].T, precision=_HIGHEST) + params["l3b"]
    g3 = (f + params["c3b"])[:, :, None]                  # (B, 64, 1)
    f = jnp.dot(f, params["l4w"].T, precision=_HIGHEST) + params["l4b"]
    g4 = (f + params["c4b"])[:, :, None]                  # (B, 32, 1)

    c1w = params["c1w"]                                   # (128, 3) f32  (VPU stage)
    c2w = params["c2w"].astype(jnp.bfloat16)              # MXU weights -> bf16 operands
    c3w = params["c3w"].astype(jnp.bfloat16)
    c4w = params["c4w"].astype(jnp.bfloat16)
    cfwT = params["cfw"].T                                # (32, 3) f32  (VPU stage)
    cfb = params["cfb"][:, None]                          # (3, 1)

    act_spec = pl.BlockSpec((bb, IMAGE_CH, tile_hw), lambda b, t: (b, 0, t))

    def g_spec(ch):
        return pl.BlockSpec((bb, ch, 1), lambda b, t: (b, 0, 0))

    def const_spec(arr):
        return pl.BlockSpec(arr.shape, lambda b, t: (0, 0))

    flops_per_px = 2 * (IMAGE_CH * HIDDEN_CH[0] + HIDDEN_CH[0] * HIDDEN_CH[1]
                        + HIDDEN_CH[1] * HIDDEN_CH[2] + HIDDEN_CH[2] * HIDDEN_CH[3]
                        + HIDDEN_CH[3] * IMAGE_CH)
    param_bytes = int(sum(int(a.size) * a.dtype.itemsize
                          for a in (c1w, c2w, c3w, c4w, cfwT, cfb, g1, g2, g3, g4)))
    cost = pl.CostEstimate(
        flops=int(B * hw_pad * flops_per_px),
        transcendentals=0,
        bytes_accessed=int(2 * B * C * hw_pad * 4 + param_bytes),
    )

    out = pl.pallas_call(
        _refine_kernel,
        grid=grid,
        in_specs=[
            act_spec,                                      # patch (B, 3, hw_pad)
            g_spec(HIDDEN_CH[0]), g_spec(HIDDEN_CH[1]),    # per-batch feature terms
            g_spec(HIDDEN_CH[2]), g_spec(HIDDEN_CH[3]),
            const_spec(c1w), const_spec(c2w), const_spec(c3w), const_spec(c4w),
            const_spec(cfwT), const_spec(cfb),
        ],
        out_specs=act_spec,
        out_shape=jax.ShapeDtypeStruct((B, C, hw_pad), jnp.float32),
        input_output_aliases={0: 0},                       # reuse patch HBM buffer
        compiler_params=pltpu.CompilerParams(
            dimension_semantics=("parallel", "parallel"),
            vmem_limit_bytes=32 * 1024 * 1024),
        cost_estimate=cost,
    )(patch, g1, g2, g3, g4, c1w, c2w, c3w, c4w, cfwT, cfb)

    if hw_pad != HW:
        out = out[:, :, :HW]
    return out.reshape(B, C, H, W)


def _reference_forward(patch_nchw, feature, params):
    """Pure-JAX f32 reference mirroring the PyTorch forward (channels-first)."""
    B, C, H, W = patch_nchw.shape
    x = patch_nchw.reshape(B, C, H * W).astype(jnp.float32)
    f = feature.astype(jnp.float32)
    p = x
    for lw, lb, cw, cb in (("l1w", "l1b", "c1w", "c1b"),
                           ("l2w", "l2b", "c2w", "c2b"),
                           ("l3w", "l3b", "c3w", "c3b"),
                           ("l4w", "l4b", "c4w", "c4b")):
        f = jnp.dot(f, params[lw].T, precision=_HIGHEST) + params[lb]
        p = (jnp.einsum("oc,bcn->bon", params[cw], p, precision=_HIGHEST)
             + params[cb][None, :, None] + f[:, :, None])
        p = jnp.maximum(p, 0.0)
    out = (jnp.einsum("oc,bcn->bon", params["cfw"], p, precision=_HIGHEST)
           + params["cfb"][None, :, None] + x)
    return jnp.clip(out, 0.0, 1.0).reshape(B, C, H, W)


def _mixed_reference_forward(patch_nchw, feature, params):
    """Mirrors kernel arithmetic: f32 stage-1/final conv, bf16-operand stages 2-4."""
    B, C, H, W = patch_nchw.shape
    x = patch_nchw.reshape(B, C, H * W).astype(jnp.float32)
    f = feature.astype(jnp.float32)
    f = jnp.dot(f, params["l1w"].T, precision=_HIGHEST) + params["l1b"]
    p = (jnp.einsum("oc,bcn->bon", params["c1w"], x, precision=_HIGHEST)
         + params["c1b"][None, :, None] + f[:, :, None])
    p = jnp.maximum(p, 0.0)
    for lw, lb, cw, cb in (("l2w", "l2b", "c2w", "c2b"),
                           ("l3w", "l3b", "c3w", "c3b"),
                           ("l4w", "l4b", "c4w", "c4b")):
        f = jnp.dot(f, params[lw].T, precision=_HIGHEST) + params[lb]
        p = (jnp.einsum("oc,bcn->bon",
                        params[cw].astype(jnp.bfloat16), p.astype(jnp.bfloat16),
                        preferred_element_type=jnp.float32)
             + params[cb][None, :, None] + f[:, :, None])
        p = jnp.maximum(p, 0.0)
    out = (jnp.einsum("oc,bcn->bon", params["cfw"], p, precision=_HIGHEST)
           + params["cfb"][None, :, None] + x)
    return jnp.clip(out, 0.0, 1.0).reshape(B, C, H, W)


if __name__ == "__main__":
    key = jax.random.PRNGKey(0)
    k_patch, k_feat, k_params = jax.random.split(key, 3)
    params = init_params(k_params)

    B, H, W = 2, 16, 16
    patch = jax.random.uniform(k_patch, (B, IMAGE_CH, H, W), jnp.float32)  # NCHW in [0,1]
    feature = jax.random.normal(k_feat, (B, FEATURE_SIZE), jnp.float32)    # backbone stand-in

    out = jax.block_until_ready(net_forward(patch, feature, params))
    assert out.shape == (B, IMAGE_CH, H, W)
    assert bool(jnp.all(out >= 0.0)) and bool(jnp.all(out <= 1.0))

    # Tight check vs. a reference that mirrors the kernel's mixed precision.
    mixed = _mixed_reference_forward(patch, feature, params)
    err_mixed = float(jnp.max(jnp.abs(out - mixed)))
    assert err_mixed < 5e-3, f"mismatch vs mixed-precision reference: {err_mixed}"

    # Looser check vs. the pure-f32 reference (bf16 matmul-operand error budget).
    ref = _reference_forward(patch, feature, params)
    err_f32 = float(jnp.max(jnp.abs(out - ref)))
    assert err_f32 < 5e-2, f"mismatch vs f32 reference: {err_f32}"

    # Second shape: odd spatial size exercises the lane-padding path.
    k2a, k2b = jax.random.split(jax.random.PRNGKey(1))
    patch2 = jax.random.uniform(k2a, (1, IMAGE_CH, 17, 17), jnp.float32)
    feature2 = jax.random.normal(k2b, (1, FEATURE_SIZE), jnp.float32)
    out2 = jax.block_until_ready(net_forward(patch2, feature2, params))
    assert out2.shape == (1, IMAGE_CH, 17, 17)
    e2m = float(jnp.max(jnp.abs(out2 - _mixed_reference_forward(patch2, feature2, params))))
    e2f = float(jnp.max(jnp.abs(out2 - _reference_forward(patch2, feature2, params))))
    assert e2m < 5e-3, f"padded-path mismatch vs mixed reference: {e2m}"
    assert e2f < 5e-2, f"padded-path mismatch vs f32 reference: {e2f}"

    print("KERNEL_OK")
</pallas_src>

<mosaic_0001>
module attributes {stable_mosaic.version = 11 : i64} {
  func.func @_refine_kernel(%arg0: i32, %arg1: i32, %arg2: memref<1x3x256xf32, #tpu.memory_space<vmem>>, %arg3: memref<1x128x1xf32, #tpu.memory_space<vmem>>, %arg4: memref<1x128x1xf32, #tpu.memory_space<vmem>>, %arg5: memref<1x64x1xf32, #tpu.memory_space<vmem>>, %arg6: memref<1x32x1xf32, #tpu.memory_space<vmem>>, %arg7: memref<128x3xf32, #tpu.memory_space<vmem>>, %arg8: memref<128x128xbf16, #tpu.memory_space<vmem>>, %arg9: memref<64x128xbf16, #tpu.memory_space<vmem>>, %arg10: memref<32x64xbf16, #tpu.memory_space<vmem>>, %arg11: memref<32x3xf32, #tpu.memory_space<vmem>>, %arg12: memref<3x1xf32, #tpu.memory_space<vmem>>, %arg13: memref<1x3x256xf32, #tpu.memory_space<vmem>>) attributes {dimension_semantics = [#tpu.dimension_semantics<parallel>, #tpu.dimension_semantics<parallel>], iteration_bounds = array<i64: 2, 1>, scalar_prefetch = 0 : i64, scratch_operands = 0 : i64, tpu.core_type = #tpu.core_type<tc>, window_params = [{transform_indices = @transform_0, window_bounds = array<i64: 1, 3, 256>}, {transform_indices = @transform_1, window_bounds = array<i64: 1, 128, 1>}, {transform_indices = @transform_2, window_bounds = array<i64: 1, 128, 1>}, {transform_indices = @transform_3, window_bounds = array<i64: 1, 64, 1>}, {transform_indices = @transform_4, window_bounds = array<i64: 1, 32, 1>}, {pipeline_mode = #tpu.pipeline_mode<synchronous>, transform_indices = @transform_5, window_bounds = array<i64: 128, 3>}, {pipeline_mode = #tpu.pipeline_mode<synchronous>, transform_indices = @transform_6, window_bounds = array<i64: 128, 128>}, {pipeline_mode = #tpu.pipeline_mode<synchronous>, transform_indices = @transform_7, window_bounds = array<i64: 64, 128>}, {pipeline_mode = #tpu.pipeline_mode<synchronous>, transform_indices = @transform_8, window_bounds = array<i64: 32, 64>}, {pipeline_mode = #tpu.pipeline_mode<synchronous>, transform_indices = @transform_9, window_bounds = array<i64: 32, 3>}, {pipeline_mode = #tpu.pipeline_mode<synchronous>, transform_indices = @transform_10, window_bounds = array<i64: 3, 1>}, {transform_indices = @transform_11, window_bounds = array<i64: 1, 3, 256>}]} {
    %c0 = arith.constant 0 : index
    %c0_0 = arith.constant 0 : index
    %0 = vector.load %arg7[%c0, %c0_0] : memref<128x3xf32, #tpu.memory_space<vmem>>, vector<128x3xf32>
    %c0_1 = arith.constant 0 : index
    %c0_2 = arith.constant 0 : index
    %1 = vector.load %arg8[%c0_1, %c0_2] : memref<128x128xbf16, #tpu.memory_space<vmem>>, vector<128x128xbf16>
    %c0_3 = arith.constant 0 : index
    %c0_4 = arith.constant 0 : index
    %2 = vector.load %arg9[%c0_3, %c0_4] : memref<64x128xbf16, #tpu.memory_space<vmem>>, vector<64x128xbf16>
    %c0_5 = arith.constant 0 : index
    %c0_6 = arith.constant 0 : index
    %3 = vector.load %arg10[%c0_5, %c0_6] : memref<32x64xbf16, #tpu.memory_space<vmem>>, vector<32x64xbf16>
    %c0_7 = arith.constant 0 : index
    %c0_8 = arith.constant 0 : index
    %4 = vector.load %arg11[%c0_7, %c0_8] : memref<32x3xf32, #tpu.memory_space<vmem>>, vector<32x3xf32>
    %c0_9 = arith.constant 0 : index
    %c0_10 = arith.constant 0 : index
    %5 = vector.load %arg12[%c0_9, %c0_10] : memref<3x1xf32, #tpu.memory_space<vmem>>, vector<3x1xf32>
    %c0_11 = arith.constant 0 : index
    %c0_12 = arith.constant 0 : index
    %c0_13 = arith.constant 0 : index
    %6 = vector.load %arg2[%c0_11, %c0_12, %c0_13] : memref<1x3x256xf32, #tpu.memory_space<vmem>>, vector<1x3x256xf32>
    %7 = vector.shape_cast %6 : vector<1x3x256xf32> to vector<3x256xf32>
    %8 = vector.extract_strided_slice %0 {offsets = [0, 0], sizes = [128, 1], strides = [1, 1]} : vector<128x3xf32> to vector<128x1xf32>
    %9 = vector.extract_strided_slice %7 {offsets = [0, 0], sizes = [1, 256], strides = [1, 1]} : vector<3x256xf32> to vector<1x256xf32>
    %10 = vector.broadcast %8 : vector<128x1xf32> to vector<128x256xf32>
    %11 = vector.broadcast %9 : vector<1x256xf32> to vector<128x256xf32>
    %12 = arith.mulf %10, %11 : vector<128x256xf32>
    %13 = vector.extract_strided_slice %0 {offsets = [0, 1], sizes = [128, 1], strides = [1, 1]} : vector<128x3xf32> to vector<128x1xf32>
    %14 = vector.extract_strided_slice %7 {offsets = [1, 0], sizes = [1, 256], strides = [1, 1]} : vector<3x256xf32> to vector<1x256xf32>
    %15 = vector.broadcast %13 : vector<128x1xf32> to vector<128x256xf32>
    %16 = vector.broadcast %14 : vector<1x256xf32> to vector<128x256xf32>
    %17 = arith.mulf %15, %16 : vector<128x256xf32>
    %18 = arith.addf %12, %17 : vector<128x256xf32>
    %19 = vector.extract_strided_slice %0 {offsets = [0, 2], sizes = [128, 1], strides = [1, 1]} : vector<128x3xf32> to vector<128x1xf32>
    %20 = vector.extract_strided_slice %7 {offsets = [2, 0], sizes = [1, 256], strides = [1, 1]} : vector<3x256xf32> to vector<1x256xf32>
    %21 = vector.broadcast %19 : vector<128x1xf32> to vector<128x256xf32>
    %22 = vector.broadcast %20 : vector<1x256xf32> to vector<128x256xf32>
    %23 = arith.mulf %21, %22 : vector<128x256xf32>
    %24 = arith.addf %18, %23 : vector<128x256xf32>
    %c0_14 = arith.constant 0 : index
    %c0_15 = arith.constant 0 : index
    %c0_16 = arith.constant 0 : index
    %25 = vector.load %arg3[%c0_14, %c0_15, %c0_16] : memref<1x128x1xf32, #tpu.memory_space<vmem>>, vector<1x128x1xf32>
    %26 = vector.shape_cast %25 : vector<1x128x1xf32> to vector<128x1xf32>
    %27 = vector.broadcast %26 : vector<128x1xf32> to vector<128x256xf32>
    %28 = arith.addf %24, %27 : vector<128x256xf32>
    %cst = arith.constant 0.000000e+00 : f32
    %29 = vector.broadcast %cst : f32 to vector<128x256xf32>
    %30 = arith.maximumf %28, %29 : vector<128x256xf32>
    %31 = arith.truncf %30 : vector<128x256xf32> to vector<128x256xbf16>
    %cst_17 = arith.constant dense<0.000000e+00> : vector<128x256xf32>
    %32 = tpu.matmul %1, %31, %cst_17 {dimension_numbers = #tpu.dot_dimension_numbers<[1], [0], [0], [1], [0, 0, 1, 1], [], []>} : vector<128x128xbf16>, vector<128x256xbf16>, vector<128x256xf32> -> vector<128x256xf32>
    %c0_18 = arith.constant 0 : index
    %c0_19 = arith.constant 0 : index
    %c0_20 = arith.constant 0 : index
    %33 = vector.load %arg4[%c0_18, %c0_19, %c0_20] : memref<1x128x1xf32, #tpu.memory_space<vmem>>, vector<1x128x1xf32>
    %34 = vector.shape_cast %33 : vector<1x128x1xf32> to vector<128x1xf32>
    %35 = vector.broadcast %34 : vector<128x1xf32> to vector<128x256xf32>
    %36 = arith.addf %32, %35 : vector<128x256xf32>
    %cst_21 = arith.constant 0.000000e+00 : f32
    %37 = vector.broadcast %cst_21 : f32 to vector<128x256xf32>
    %38 = arith.maximumf %36, %37 : vector<128x256xf32>
    %39 = arith.truncf %38 : vector<128x256xf32> to vector<128x256xbf16>
    %cst_22 = arith.constant dense<0.000000e+00> : vector<64x256xf32>
    %40 = tpu.matmul %2, %39, %cst_22 {dimension_numbers = #tpu.dot_dimension_numbers<[1], [0], [0], [1], [0, 0, 1, 1], [], []>} : vector<64x128xbf16>, vector<128x256xbf16>, vector<64x256xf32> -> vector<64x256xf32>
    %c0_23 = arith.constant 0 : index
    %c0_24 = arith.constant 0 : index
    %c0_25 = arith.constant 0 : index
    %41 = vector.load %arg5[%c0_23, %c0_24, %c0_25] : memref<1x64x1xf32, #tpu.memory_space<vmem>>, vector<1x64x1xf32>
    %42 = vector.shape_cast %41 : vector<1x64x1xf32> to vector<64x1xf32>
    %43 = vector.broadcast %42 : vector<64x1xf32> to vector<64x256xf32>
    %44 = arith.addf %40, %43 : vector<64x256xf32>
    %cst_26 = arith.constant 0.000000e+00 : f32
    %45 = vector.broadcast %cst_26 : f32 to vector<64x256xf32>
    %46 = arith.maximumf %44, %45 : vector<64x256xf32>
    %47 = arith.truncf %46 : vector<64x256xf32> to vector<64x256xbf16>
    %cst_27 = arith.constant dense<0.000000e+00> : vector<32x256xf32>
    %48 = tpu.matmul %3, %47, %cst_27 {dimension_numbers = #tpu.dot_dimension_numbers<[1], [0], [0], [1], [0, 0, 1, 1], [], []>} : vector<32x64xbf16>, vector<64x256xbf16>, vector<32x256xf32> -> vector<32x256xf32>
    %c0_28 = arith.constant 0 : index
    %c0_29 = arith.constant 0 : index
    %c0_30 = arith.constant 0 : index
    %49 = vector.load %arg6[%c0_28, %c0_29, %c0_30] : memref<1x32x1xf32, #tpu.memory_space<vmem>>, vector<1x32x1xf32>
    %50 = vector.shape_cast %49 : vector<1x32x1xf32> to vector<32x1xf32>
    %51 = vector.broadcast %50 : vector<32x1xf32> to vector<32x256xf32>
    %52 = arith.addf %48, %51 : vector<32x256xf32>
    %cst_31 = arith.constant 0.000000e+00 : f32
    %53 = vector.broadcast %cst_31 : f32 to vector<32x256xf32>
    %54 = arith.maximumf %52, %53 : vector<32x256xf32>
    %55 = vector.extract_strided_slice %4 {offsets = [0, 0], sizes = [32, 1], strides = [1, 1]} : vector<32x3xf32> to vector<32x1xf32>
    %56 = vector.broadcast %55 : vector<32x1xf32> to vector<32x256xf32>
    %57 = arith.mulf %56, %54 : vector<32x256xf32>
    %cst_32 = arith.constant dense<0.000000e+00> : vector<256xf32>
    %58 = vector.multi_reduction <add>, %57, %cst_32 [0] : vector<32x256xf32> to vector<256xf32>
    %59 = vector.shape_cast %58 : vector<256xf32> to vector<1x256xf32>
    %60 = vector.extract_strided_slice %5 {offsets = [0, 0], sizes = [1, 1], strides = [1, 1]} : vector<3x1xf32> to vector<1x1xf32>
    %61 = vector.broadcast %60 : vector<1x1xf32> to vector<1x256xf32>
    %62 = arith.addf %59, %61 : vector<1x256xf32>
    %63 = vector.extract_strided_slice %7 {offsets = [0, 0], sizes = [1, 256], strides = [1, 1]} : vector<3x256xf32> to vector<1x256xf32>
    %64 = arith.addf %62, %63 : vector<1x256xf32>
    %cst_33 = arith.constant 0.000000e+00 : f32
    %cst_34 = arith.constant 1.000000e+00 : f32
    %65 = vector.broadcast %cst_33 : f32 to vector<1x256xf32>
    %66 = arith.maximumf %65, %64 : vector<1x256xf32>
    %67 = vector.broadcast %cst_34 : f32 to vector<1x256xf32>
    %68 = arith.minimumf %67, %66 : vector<1x256xf32>
    %c0_35 = arith.constant 0 : index
    %c0_36 = arith.constant 0 : index
    %c0_37 = arith.constant 0 : index
    %69 = vector.load %arg13[%c0_35, %c0_36, %c0_37] : memref<1x3x256xf32, #tpu.memory_space<vmem>>, vector<1x1x256xf32>
    %70 = vector.shape_cast %69 : vector<1x1x256xf32> to vector<1x256xf32>
    %71 = vector.shape_cast %68 : vector<1x256xf32> to vector<1x1x256xf32>
    tpu.vector_store %arg13[%c0_35, %c0_36, %c0_37], %71 {strides = array<i32>} : memref<1x3x256xf32, #tpu.memory_space<vmem>>, vector<1x1x256xf32>,
    %72 = vector.extract_strided_slice %4 {offsets = [0, 1], sizes = [32, 1], strides = [1, 1]} : vector<32x3xf32> to vector<32x1xf32>
    %73 = vector.broadcast %72 : vector<32x1xf32> to vector<32x256xf32>
    %74 = arith.mulf %73, %54 : vector<32x256xf32>
    %cst_38 = arith.constant dense<0.000000e+00> : vector<256xf32>
    %75 = vector.multi_reduction <add>, %74, %cst_38 [0] : vector<32x256xf32> to vector<256xf32>
    %76 = vector.shape_cast %75 : vector<256xf32> to vector<1x256xf32>
    %77 = vector.extract_strided_slice %5 {offsets = [1, 0], sizes = [1, 1], strides = [1, 1]} : vector<3x1xf32> to vector<1x1xf32>
    %78 = vector.broadcast %77 : vector<1x1xf32> to vector<1x256xf32>
    %79 = arith.addf %76, %78 : vector<1x256xf32>
    %80 = vector.extract_strided_slice %7 {offsets = [1, 0], sizes = [1, 256], strides = [1, 1]} : vector<3x256xf32> to vector<1x256xf32>
    %81 = arith.addf %79, %80 : vector<1x256xf32>
    %cst_39 = arith.constant 0.000000e+00 : f32
    %cst_40 = arith.constant 1.000000e+00 : f32
    %82 = vector.broadcast %cst_39 : f32 to vector<1x256xf32>
    %83 = arith.maximumf %82, %81 : vector<1x256xf32>
    %84 = vector.broadcast %cst_40 : f32 to vector<1x256xf32>
    %85 = arith.minimumf %84, %83 : vector<1x256xf32>
    %c0_41 = arith.constant 0 : index
    %c1 = arith.constant 1 : index
    %c0_42 = arith.constant 0 : index
    %86 = vector.load %arg13[%c0_41, %c1, %c0_42] : memref<1x3x256xf32, #tpu.memory_space<vmem>>, vector<1x1x256xf32>
    %87 = vector.shape_cast %86 : vector<1x1x256xf32> to vector<1x256xf32>
    %88 = vector.shape_cast %85 : vector<1x256xf32> to vector<1x1x256xf32>
    tpu.vector_store %arg13[%c0_41, %c1, %c0_42], %88 {strides = array<i32>} : memref<1x3x256xf32, #tpu.memory_space<vmem>>, vector<1x1x256xf32>,
    %89 = vector.extract_strided_slice %4 {offsets = [0, 2], sizes = [32, 1], strides = [1, 1]} : vector<32x3xf32> to vector<32x1xf32>
    %90 = vector.broadcast %89 : vector<32x1xf32> to vector<32x256xf32>
    %91 = arith.mulf %90, %54 : vector<32x256xf32>
    %cst_43 = arith.constant dense<0.000000e+00> : vector<256xf32>
    %92 = vector.multi_reduction <add>, %91, %cst_43 [0] : vector<32x256xf32> to vector<256xf32>
    %93 = vector.shape_cast %92 : vector<256xf32> to vector<1x256xf32>
    %94 = vector.extract_strided_slice %5 {offsets = [2, 0], sizes = [1, 1], strides = [1, 1]} : vector<3x1xf32> to vector<1x1xf32>
    %95 = vector.broadcast %94 : vector<1x1xf32> to vector<1x256xf32>
    %96 = arith.addf %93, %95 : vector<1x256xf32>
    %97 = vector.extract_strided_slice %7 {offsets = [2, 0], sizes = [1, 256], strides = [1, 1]} : vector<3x256xf32> to vector<1x256xf32>
    %98 = arith.addf %96, %97 : vector<1x256xf32>
    %cst_44 = arith.constant 0.000000e+00 : f32
    %cst_45 = arith.constant 1.000000e+00 : f32
    %99 = vector.broadcast %cst_44 : f32 to vector<1x256xf32>
    %100 = arith.maximumf %99, %98 : vector<1x256xf32>
    %101 = vector.broadcast %cst_45 : f32 to vector<1x256xf32>
    %102 = arith.minimumf %101, %100 : vector<1x256xf32>
    %c0_46 = arith.constant 0 : index
    %c2 = arith.constant 2 : index
    %c0_47 = arith.constant 0 : index
    %103 = vector.load %arg13[%c0_46, %c2, %c0_47] : memref<1x3x256xf32, #tpu.memory_space<vmem>>, vector<1x1x256xf32>
    %104 = vector.shape_cast %103 : vector<1x1x256xf32> to vector<1x256xf32>
    %105 = vector.shape_cast %102 : vector<1x256xf32> to vector<1x1x256xf32>
    tpu.vector_store %arg13[%c0_46, %c2, %c0_47], %105 {strides = array<i32>} : memref<1x3x256xf32, #tpu.memory_space<vmem>>, vector<1x1x256xf32>,
    return
  }
  func.func @transform_0(%arg0: i32, %arg1: i32) -> (i32, i32, i32) {
    %c0_i32 = arith.constant 0 : i32
    %c0_i32_0 = arith.constant 0 : i32
    return %arg0, %c0_i32, %arg1 : i32, i32, i32
  }
  func.func @transform_1(%arg0: i32, %arg1: i32) -> (i32, i32, i32) {
    %c0_i32 = arith.constant 0 : i32
    %c0_i32_0 = arith.constant 0 : i32
    %c0_i32_1 = arith.constant 0 : i32
    return %arg0, %c0_i32, %c0_i32_0 : i32, i32, i32
  }
  func.func @transform_2(%arg0: i32, %arg1: i32) -> (i32, i32, i32) {
    %c0_i32 = arith.constant 0 : i32
    %c0_i32_0 = arith.constant 0 : i32
    %c0_i32_1 = arith.constant 0 : i32
    return %arg0, %c0_i32, %c0_i32_0 : i32, i32, i32
  }
  func.func @transform_3(%arg0: i32, %arg1: i32) -> (i32, i32, i32) {
    %c0_i32 = arith.constant 0 : i32
    %c0_i32_0 = arith.constant 0 : i32
    %c0_i32_1 = arith.constant 0 : i32
    return %arg0, %c0_i32, %c0_i32_0 : i32, i32, i32
  }
  func.func @transform_4(%arg0: i32, %arg1: i32) -> (i32, i32, i32) {
    %c0_i32 = arith.constant 0 : i32
    %c0_i32_0 = arith.constant 0 : i32
    %c0_i32_1 = arith.constant 0 : i32
    return %arg0, %c0_i32, %c0_i32_0 : i32, i32, i32
  }
  func.func @transform_5(%arg0: i32, %arg1: i32) -> (i32, i32) {
    %c0_i32 = arith.constant 0 : i32
    %c0_i32_0 = arith.constant 0 : i32
    %c0_i32_1 = arith.constant 0 : i32
    return %c0_i32, %c0_i32_0 : i32, i32
  }
  func.func @transform_6(%arg0: i32, %arg1: i32) -> (i32, i32) {
    %c0_i32 = arith.constant 0 : i32
    %c0_i32_0 = arith.constant 0 : i32
    %c0_i32_1 = arith.constant 0 : i32
    return %c0_i32, %c0_i32_0 : i32, i32
  }
  func.func @transform_7(%arg0: i32, %arg1: i32) -> (i32, i32) {
    %c0_i32 = arith.constant 0 : i32
    %c0_i32_0 = arith.constant 0 : i32
    %c0_i32_1 = arith.constant 0 : i32
    return %c0_i32, %c0_i32_0 : i32, i32
  }
  func.func @transform_8(%arg0: i32, %arg1: i32) -> (i32, i32) {
    %c0_i32 = arith.constant 0 : i32
    %c0_i32_0 = arith.constant 0 : i32
    %c0_i32_1 = arith.constant 0 : i32
    return %c0_i32, %c0_i32_0 : i32, i32
  }
  func.func @transform_9(%arg0: i32, %arg1: i32) -> (i32, i32) {
    %c0_i32 = arith.constant 0 : i32
    %c0_i32_0 = arith.constant 0 : i32
    %c0_i32_1 = arith.constant 0 : i32
    return %c0_i32, %c0_i32_0 : i32, i32
  }
  func.func @transform_10(%arg0: i32, %arg1: i32) -> (i32, i32) {
    %c0_i32 = arith.constant 0 : i32
    %c0_i32_0 = arith.constant 0 : i32
    %c0_i32_1 = arith.constant 0 : i32
    return %c0_i32, %c0_i32_0 : i32, i32
  }
  func.func @transform_11(%arg0: i32, %arg1: i32) -> (i32, i32, i32) {
    %c0_i32 = arith.constant 0 : i32
    %c0_i32_0 = arith.constant 0 : i32
    return %arg0, %c0_i32, %arg1 : i32, i32, i32
  }
}

</mosaic_0001>

<bundles_post_ra>
// kernel: net_forward.1
= control target key start
LH: loop header
LB: loop body
LE: loop exit
PB: predicated region body
PF: predicated region fallthrough
CT: control target
= control target key end

     0   :  { %s2242_s17 = smov 0   ;;  %s2244_s18 = smov 0   ;;  %s2886_s0 = inlined_call_operand.vmem [shape: f32[2,3,256], index: 0, kind: input, shape index: {}, may-alias: {0,11}]   ;;  %s2887_s1 = inlined_call_operand.vmem [shape: f32[2,128,1], index: 1, kind: input, shape index: {}]   ;;  %s2888_s2 = inlined_call_operand.vmem [shape: f32[2,128,1], index: 2, kind: input, shape index: {}]   ;;  %s2889_s3 = inlined_call_operand.vmem [shape: f32[2,64,1], index: 3, kind: input, shape index: {}]   ;;  %s2890_s4 = inlined_call_operand.vmem [shape: f32[2,32,1], index: 4, kind: input, shape index: {}]   ;;  %s2891_s5 = inlined_call_operand.vmem [shape: f32[128,3], index: 5, kind: input, shape index: {}]   ;;  %s2892_s6 = inlined_call_operand.vmem [shape: bf16[128,128], index: 6, kind: input, shape index: {}]   ;;  %s2893_s7 = inlined_call_operand.vmem [shape: bf16[64,128], index: 7, kind: input, shape index: {}]   ;;  %s2894_s8 = inlined_call_operand.vmem [shape: bf16[32,64], index: 8, kind: input, shape index: {}]   ;;  %s2895_s9 = inlined_call_operand.vmem [shape: f32[32,3], index: 9, kind: input, shape index: {}]   ;;  %s2896_s10 = inlined_call_operand.vmem [shape: f32[3,1], index: 10, kind: input, shape index: {}]   ;;  %s2897_s11 = inlined_call_operand.vmem [shape: f32[2,3,256], index: 11, kind: output, shape index: {}, may-alias: {0,11}]  }
   0x1   :  { %s2246_s19 = smov 0  }
   0x2 LB: > { %s33_s20 = sadd.s32 1, %s2173_s18  ;;  %p1978_p0 = scmp.ge.s32.totalorder %s2177_s19, 1  ;;  %s2177_s19 = sphi %s2246_s19, %s21_s19   ;;  %s2173_s18 = sphi %s2244_s18, %s2901_s18   ;;  %s2169_s17 = sphi %s2242_s17, %s2900_s17  }
   0x3   : > { %p35_p1 = scmp.ge.s32.totalorder %s33_s20, 2  ;;  %p398_p2 = scmp.lt.s32.totalorder %s2177_s19, 3 }
   0x5   : > { %s2903_s20 = smov (%p35_p1, %s33_s20), 0  ;;  %p399_p3 = pnand %p1978_p0, %p398_p2 }
   0x6   : > { %p467_p4 = scmp.lt.s32.totalorder (!%p399_p3), %s2169_s17, 1 }
   0x7   : > { %402 = sbr.rel (%p399_p3) target bundleno = 1045 (0x415), region = 64 }
   0xc   : > { %v521_v0 = vld [vmem:[%s2891_s5 + $0x70] sm:$0xff]  ;;  %v520_v1 = vld [vmem:[%s2891_s5 + $0x68] sm:$0xff]  ;;  %v2179_v2 = vmov 2   ;;  %v2180_v3 = vmov 1   ;;  %v522_v4 = vld [vmem:[%s2891_s5 + $0x78] sm:$0xff]  ;;  %v2181_v8 = vmov 0  }
   0xd   : > { %2103 = vset.pattern.permute.xlu2 %v2179_v2  ;;  %2106 = vset.pattern.permute.xlu0 %v2180_v3  ;;  %v515_v5 = vld [vmem:[%s2891_s5 + $0x40] sm:$0xff]  ;;  %v518_v7 = vld [vmem:[%s2891_s5 + $0x58] sm:$0xff]  ;;  %s2905_s17 = smov (!%p467_p4, %s2169_s17), 1  ;;  %v2293_v9 = vld [vmem:[%s2891_s5 + $0x30] sm:$0xff]  ;;  %vm1598_vm0 = vcmask 523264   ;;  %vm1713_vm1 = vcmask 1040384  }
   0xe   : > { %2102 = vset.pattern.permute.xlu1 %v2180_v3  ;;  %867 = vperm.xlu2 %2103, %v521_v0   ;;  %v519_v6 = vld [vmem:[%s2891_s5 + $0x60] sm:$0xff]  ;;  %s2056_s16 = sshll.u32 %s2905_s17, 7  ;;  %v2309_v10 = vld [vmem:[%s2891_s5 + $0x10] sm:$0xff]  ;;  %v516_v16 = vld [vmem:[%s2891_s5 + $0x48] sm:$0xff]  ;;  %s2058_s14 = sshll.u32 %s2905_s17, 6 }
   0xf   : > { %733 = vperm.xlu1 %2102, %v521_v0   ;;  %729 = vperm.xlu0 %2106, %v520_v1   ;;  %s2304_s23 = scalar_lea.vmem %s2887_s1, %s2056_s16  ;;  %v517_v13 = vld [vmem:[%s2891_s5 + $0x50] sm:$0xff]  ;;  %v512_v18 = vld [vmem:[%s2891_s5 + $0x28] sm:$0xff]  ;;  %v514_v22 = vld [vmem:[%s2891_s5 + $0x38] sm:$0xff]  ;;  %s2391_s29 = scalar_lea.vmem %s2888_s2, %s2056_s16 }
  0x10   : > { %v958_v11 = vld [vmem:[%s2304_s23 + $0x70] sm:$0xff]  ;;  %v959_v12 = vld [vmem:[%s2304_s23 + $0x78] sm:$0xff]  ;;  %v956_v14 = vld [vmem:[%s2304_s23 + $0x60] sm:$0xff]  ;;  %s2055_s16 = sshll.u32 %s2905_s17, 3  ;;  %s2482_s22 = scalar_lea.vmem %s2889_s3, %s2058_s14 }
  0x11   : > { %v957_v15 = vld [vmem:[%s2304_s23 + $0x68] sm:$0xff]  ;;  %v955_v17 = vld [vmem:[%s2304_s23 + $0x58] sm:$0xff]  ;;  %v954_v19 = vld [vmem:[%s2304_s23 + $0x50] sm:$0xff]  ;;  %s474_s13 = scalar_lea.vmem %s2886_s0, %s2055_s16  ;;  %s2059_s26 = sshll.u32 %s2905_s17, 5 }
  0x12   : > { %v950_v20 = vld [vmem:[%s2304_s23 + $0x30] sm:$0xff]  ;;  %v2350_v23 = vld [vmem:[%s2891_s5 + $0x18] sm:$0xff]  ;;  %v2359_v25 = vld [vmem:[%s2891_s5 + $0x8] sm:$0xff]  ;;  %s2569_s30 = scalar_lea.vmem %s2890_s4, %s2059_s26  ;;  %s504_s28 = scalar_lea.vmem %s2897_s11, %s2055_s16 }
  0x13   : > { %v952_v27 = vld [vmem:[%s2304_s23 + $0x40] sm:$0xff]  ;;  %v946_v28 = vld [vmem:[%s2304_s23 + $0x10] sm:$0xff]  ;;  %v945_v33 = vld [vmem:[%s2304_s23 + $0x8] sm:$0xff] }
  0x14   : > { %v511_v32 = vld [vmem:[%s2891_s5 + $0x20] sm:$0xff]  ;;  %v953_v34 = vld [vmem:[%s2304_s23 + $0x48] sm:$0xff]  ;;  %v1131_v41 = vld [vmem:[%s2391_s29 + $0x58] sm:$0xff] }
  0x15   : > { %v1132_v37 = vld [vmem:[%s2391_s29 + $0x60] sm:$0xff]  ;;  %v1126_v45 = vld [vmem:[%s2391_s29 + $0x30] sm:$0xff]  ;;  %v951_v48 = vld [vmem:[%s2304_s23 + $0x38] sm:$0xff] }
  0x16   : > { %871 = vperm.xlu2 %2103, %v522_v4   ;;  %v2418_v46 = vld [vmem:[%s474_s13] sm:$0x77]  ;;  %v1125_v55 = vld [vmem:[%s2391_s29 + $0x28] sm:$0xff] }
  0x17   : > { %737 = vperm.xlu1 %2102, %v522_v4   ;;  %709 = vperm.xlu0 %2106, %v515_v5   ;;  %v740_v51 = vperm.slane %v2418_v46, 1  ;;  %v741_v52 = vperm.slane %v2418_v46, 5  ;;  %v638_v53 = vperm.slane %v2418_v46, 0  ;;  %v639_v54 = vperm.slane %v2418_v46, 4 }
  0x18   : > { %v874_v58 = vperm.slane %v2418_v46, 2  ;;  %v875_v59 = vperm.slane %v2418_v46, 6 }
  0x19   : > { %v2435_v56 = vperm.slane %v740_v51, 1  ;;  %v2439_v57 = vperm.slane %v741_v52, 1  ;;  %v2445_v60 = vperm.slane %v638_v53, 0  ;;  %v2449_v61 = vperm.slane %v639_v54, 0 }
  0x1e   : > { %2105 = vset.pattern.permute.xlu2 %v2180_v3 }
  0x1f   : > { %2104 = vset.pattern.permute.xlu1 %v2181_v8  ;;  %2116 = vset.pattern.permute.xlu0 %v2179_v2 }
  0x20   : > { %624 = vperm.xlu1 %2104, %v520_v1   ;;  %725 = vperm.xlu2 %2105, %v519_v6  }
  0x21   : > { %855 = vperm.xlu0 %2116, %v518_v7  }
  0x28   : > { %2107 = vset.pattern.permute.xlu1 %v2179_v2  ;;  %2108 = vset.pattern.permute.xlu2 %v2179_v2 }
  0x29   : > { %835 = vperm.xlu0 %2116, %v2293_v9   ;;  %859 = vperm.xlu1 %2107, %v519_v6  }
  0x2a   : > { %863 = vperm.xlu2 %2108, %v520_v1  }
  0x31   : > { %819 = vperm.xlu0 %2116, %v2309_v10   ;;  %2109 = vset.pattern.permute.xlu1 %v2181_v8 }
  0x32   : > { %2110 = vset.pattern.permute.xlu2 %v2181_v8  ;;  %1032 = vperm.xlu1 %2109, %v958_v11   ;;  %v1120_v11 = vld [vmem:[%s2391_s29] sm:$0xff] }
  0x33   : > { %1037 = vperm.xlu2 %2110, %v959_v12  }
  0x39   : > { %2135 = vset.pattern.permute.xlu0 %v2181_v8 }
  0x3a   : > { %629 = vperm.xlu0 %2135, %v521_v0   ;;  %614 = vperm.xlu1 %2109, %v518_v7  }
  0x3b   : > { %2111 = vset.pattern.permute.xlu2 %v2180_v3 }
  0x3c   : > { %717 = vperm.xlu2 %2111, %v517_v13  }
  0x42   : > { %634 = vperm.xlu0 %2135, %v522_v4   ;;  %2112 = vset.pattern.permute.xlu1 %v2180_v3  ;;  %v2457_v4 = vperm.slane %v874_v58, 2 }
  0x43   : > { %721 = vperm.xlu1 %2112, %v518_v7  }
  0x44   : > { %2113 = vset.pattern.permute.xlu2 %v2179_v2 }
  0x45   : > { %851 = vperm.xlu2 %2113, %v517_v13  }
  0x4a   : > { %619 = vperm.xlu0 %2135, %v519_v6  }
  0x4b   : > { %2114 = vset.pattern.permute.xlu1 %v2181_v8 }
  0x4c   : > { %1022 = vperm.xlu1 %2114, %v956_v14  }
  0x4d   : > { %2115 = vset.pattern.permute.xlu2 %v2181_v8 }
  0x4e   : > { %1027 = vperm.xlu2 %2115, %v957_v15  }
  0x52   : > { %609 = vperm.xlu0 %2135, %v517_v13  }
  0x54   : > { %599 = vperm.xlu1 %2114, %v515_v5  }
  0x56   : > { %604 = vperm.xlu2 %2115, %v516_v16  }
  0x5a   : > { %1017 = vperm.xlu0 %2135, %v955_v17  }
  0x5c   : > { %2117 = vset.pattern.permute.xlu1 %v2180_v3 }
  0x5d   : > { %713 = vperm.xlu1 %2117, %v516_v16  }
  0x5e   : > { %2118 = vset.pattern.permute.xlu2 %v2179_v2 }
  0x5f   : > { %843 = vperm.xlu2 %2118, %v515_v5   ;;  %v2461_v5 = vperm.slane %v875_v59, 2 }
  0x62   : > { %584 = vperm.xlu0 %2135, %v512_v18  }
  0x65   : > { %2119 = vset.pattern.permute.xlu1 %v2179_v2 }
  0x66   : > { %847 = vperm.xlu1 %2119, %v516_v16  }
  0x67   : > { %2120 = vset.pattern.permute.xlu2 %v2181_v8 }
  0x68   : > { %1012 = vperm.xlu2 %2120, %v954_v19   ;;  %v2340_v21 = vpop.permute.xlu2 %867 }
  0x69   : > { %v908_v14 = vmul.f32 %v2457_v4, %v2340_v21  ;;  %v909_v15 = vmul.f32 %v2461_v5, %v2340_v21 }
  0x6a   : > { %992 = vperm.xlu0 %2135, %v950_v20  }
  0x6e   : > { %2121 = vset.pattern.permute.xlu1 %v2181_v8 }
  0x6f   : > { %589 = vperm.xlu1 %2121, %v2293_v9  }
  0x70   : > { %594 = vperm.xlu2 %2120, %v514_v22   ;;  %v2353_v24 = vpop.permute.xlu2 %871 }
  0x72   : > { %574 = vperm.xlu0 %2135, %v2350_v23  }
  0x77   : > { %2122 = vset.pattern.permute.xlu1 %v2180_v3 }
  0x78   : > { %2123 = vset.pattern.permute.xlu2 %v2180_v3  ;;  %701 = vperm.xlu1 %2122, %v2293_v9  }
  0x79   : > { %705 = vperm.xlu2 %2123, %v514_v22  }
  0x7a   : > { %564 = vperm.xlu0 %2135, %v2359_v25   ;;  %v2364_v26 = vpop.permute.xlu2 %725 }
  0x80   : > { %2124 = vset.pattern.permute.xlu1 %v2179_v2 }
  0x81   : > { %2125 = vset.pattern.permute.xlu2 %v2181_v8  ;;  %v2370_v29 = vpop.permute.xlu1 %733  ;;  %839 = vperm.xlu1 %2124, %v514_v22   ;;  %v2372_v30 = vpop.permute.xlu0 %729 }
  0x82   : > { %1002 = vperm.xlu2 %2125, %v952_v27   ;;  %972 = vperm.xlu0 %2135, %v946_v28   ;;  %v774_v6 = vmul.f32 %v2435_v56, %v2370_v29  ;;  %v775_v7 = vmul.f32 %v2439_v57, %v2370_v29  ;;  %v948_v27 = vld [vmem:[%s2304_s23 + $0x20] sm:$0xff]  ;;  %v910_v28 = vmul.f32 %v2457_v4, %v2353_v24 }
  0x83   : > { %v911_v29 = vmul.f32 %v2461_v5, %v2353_v24 }
  0x84   : > { %v2374_v31 = vpop.permute.xlu2 %863 }
  0x89   : > { %v2381_v35 = vpop.permute.xlu1 %737  ;;  %2126 = vset.pattern.permute.xlu1 %v2181_v8  ;;  %v2384_v36 = vpop.permute.xlu0 %709 }
  0x8a   : > { %579 = vperm.xlu2 %2125, %v511_v32   ;;  %967 = vperm.xlu0 %2135, %v945_v33   ;;  %v777_v19 = vmul.f32 %v2439_v57, %v2381_v35  ;;  %v773_v33 = vmul.f32 %v2439_v57, %v2372_v30 }
  0x8b   : > { %1007 = vperm.xlu1 %2126, %v953_v34  }
  0x8d   : > { %v2394_v38 = vpop.permute.xlu2 %1037 }
  0x92   : > { %2128 = vset.pattern.permute.xlu2 %v2180_v3  ;;  %1198 = vperm.xlu0 %2135, %v1132_v37   ;;  %v2397_v39 = vpop.permute.xlu1 %624 }
  0x93   : > { %2127 = vset.pattern.permute.xlu1 %v2180_v3  ;;  %697 = vperm.xlu2 %2128, %v512_v18   ;;  %v2400_v40 = vpop.permute.xlu0 %855  ;;  %v671_v24 = vmul.f32 %v2449_v61, %v2397_v39 }
  0x94   : > { %693 = vperm.xlu1 %2127, %v511_v32  }
  0x96   : > { %v2403_v42 = vpop.permute.xlu2 %717 }
  0x9a   : > { %1193 = vperm.xlu0 %2135, %v1131_v41  }
  0x9b   : > { %2130 = vset.pattern.permute.xlu2 %v2179_v2  ;;  %v2406_v43 = vpop.permute.xlu1 %859  ;;  %v2408_v44 = vpop.permute.xlu0 %835 }
  0x9c   : > { %2129 = vset.pattern.permute.xlu1 %v2179_v2  ;;  %831 = vperm.xlu2 %2130, %v512_v18   ;;  %v776_v18 = vmul.f32 %v2435_v56, %v2381_v35  ;;  %v670_v35 = vmul.f32 %v2445_v60, %v2397_v39  ;;  %v907_v39 = vmul.f32 %v2461_v5, %v2374_v31 }
  0x9d   : > { %827 = vperm.xlu1 %2129, %v511_v32   ;;  %v772_v32 = vmul.f32 %v2435_v56, %v2372_v30 }
  0x9f   : > { %v2423_v49 = vpop.permute.xlu2 %851 }
  0xa2   : > { %1168 = vperm.xlu0 %2135, %v1126_v45   ;;  %v1417_v45 = vld [vmem:[%s2482_s22 + $0x38] sm:$0xff] }
  0xa3   : > { %v2420_v47 = vpop.permute.xlu0 %819 }
  0xa4   : > { %v1033_v50 = vpop.permute.xlu1 %1032  ;;  %2132 = vset.pattern.permute.xlu2 %v2181_v8 }
  0xa5   : > { %2131 = vset.pattern.permute.xlu1 %v2181_v8  ;;  %569 = vperm.xlu2 %2132, %v2309_v10  }
  0xa6   : > { %997 = vperm.xlu1 %2131, %v951_v48  }
  0xa8   : > { %v2467_v9 = vpop.permute.xlu2 %1027 }
  0xaa   : > { %1163 = vperm.xlu0 %2135, %v1125_v55  }
  0xac   : > { %v630_v62 = vpop.permute.xlu0 %629  ;;  %v2451_v63 = vpop.permute.xlu1 %614 }
  0xad   : > { %v672_v0 = vmul.f32 %v2445_v60, %v630_v62  ;;  %v673_v1 = vmul.f32 %v2449_v61, %v630_v62  ;;  %2134 = vset.pattern.permute.xlu2 %v2180_v3 }
  0xae   : > { %2133 = vset.pattern.permute.xlu1 %v2180_v3  ;;  %689 = vperm.xlu2 %2134, %v2350_v23  }
  0xaf   : > { %685 = vperm.xlu1 %2133, %v2309_v10   ;;  %v806_v12 = vadd.f32 %v774_v6, %v672_v0  ;;  %v807_v13 = vadd.f32 %v775_v7, %v673_v1  ;;  %v770_v0 = vmul.f32 %v2435_v56, %v2364_v26  ;;  %v771_v1 = vmul.f32 %v2439_v57, %v2364_v26 }
  0xb0   : > { %v2499_v34 = vpop.permute.xlu2 %604  ;;  %v906_v6 = vmul.f32 %v2457_v4, %v2374_v31  ;;  %v804_v7 = vadd.f32 %v772_v32, %v670_v35 }
  0xb1   : > { %v940_v17 = vadd.f32 %v908_v14, %v806_v12  ;;  %v941_v10 = vadd.f32 %v909_v15, %v807_v13 }
  0xb2   : > { %1138 = vperm.xlu0 %2135, %v1120_v11   ;;  %v805_v11 = vadd.f32 %v773_v33, %v671_v24  ;;  %v938_v32 = vadd.f32 %v906_v6, %v804_v7  ;;  %v767_v6 = vmul.f32 %v2439_v57, %v2403_v42 }
  0xb3   : > { %v1068_v48 = vadd.f32 %v1033_v50, %v940_v17  ;;  %v1069_v30 = vadd.f32 %v1033_v50, %v941_v10  ;;  %v905_v10 = vmul.f32 %v2461_v5, %v2406_v43 }
  0xb4   : > { %v635_v16 = vpop.permute.xlu0 %634  ;;  %v939_v33 = vadd.f32 %v907_v39, %v805_v11  ;;  %v667_v39 = vmul.f32 %v2449_v61, %v2451_v63  ;;  %v900_v11 = vmul.f32 %v2457_v4, %v2423_v49 }
  0xb5   : > { %v674_v20 = vmul.f32 %v2445_v60, %v635_v16  ;;  %v675_v21 = vmul.f32 %v2449_v61, %v635_v16  ;;  %v722_v22 = vpop.permute.xlu1 %721  ;;  %v1100_v13 = vmax.f32 %v1068_v48, 0.0  ;;  %v1101_v14 = vmax.f32 %v1069_v30, 0.0  ;;  %v2524_v16 = vld [vmem:[%s2891_s5] sm:$0xff] }
  0xb6   : > { %2137 = vset.pattern.permute.xlu2 %v2181_v8  ;;  %v1067_v24 = vadd.f32 %v2467_v9, %v939_v33  ;;  %v768_v48 = vmul.f32 %v2435_v56, %v722_v22  ;;  %v903_v30 = vmul.f32 %v2461_v5, %v2400_v40 }
  0xb7   : > { %v808_v37 = vadd.f32 %v776_v18, %v674_v20  ;;  %v809_v41 = vadd.f32 %v777_v19, %v675_v21  ;;  %2136 = vset.pattern.permute.xlu1 %v2179_v2  ;;  %982 = vperm.xlu2 %2137, %v948_v27   ;;  %v949_v19 = vld [vmem:[%s2304_s23 + $0x28] sm:$0xff] }
  0xb8   : > { %823 = vperm.xlu1 %2136, %v2350_v23  }
  0xb9   : > { %v942_v55 = vadd.f32 %v910_v28, %v808_v37  ;;  %v943_v62 = vadd.f32 %v911_v29, %v809_v41  ;;  %v1412_v29 = vld [vmem:[%s2482_s22 + $0x10] sm:$0xff]  ;;  %v2532_v35 = vpop.permute.xlu2 %843  ;;  %v902_v37 = vmul.f32 %v2457_v4, %v2400_v40 }
  0xba   : > { %1455 = vperm.xlu0 %2135, %v1417_v45   ;;  %v1066_v45 = vadd.f32 %v2467_v9, %v938_v32  ;;  %v666_v9 = vmul.f32 %v2445_v60, %v2451_v63 }
  0xbb   : > { %v1070_v23 = vadd.f32 %v2394_v38, %v942_v55  ;;  %v1071_v50 = vadd.f32 %v2394_v38, %v943_v62  ;;  %v904_v38 = vmul.f32 %v2457_v4, %v2406_v43  ;;  %v769_v55 = vmul.f32 %v2439_v57, %v722_v22 }
  0xbc   : > { %v620_v12 = vpop.permute.xlu0 %619 }
  0xbd   : > { %v668_v26 = vmul.f32 %v2445_v60, %v620_v12  ;;  %v669_v15 = vmul.f32 %v2449_v61, %v620_v12  ;;  %v1102_v31 = vmax.f32 %v1070_v23, 0.0  ;;  %v1103_v17 = vmax.f32 %v1071_v50, 0.0 }
  0xbe   : > { %v1023_v18 = vpop.permute.xlu1 %1022  ;;  %v1098_v12 = vmax.f32 %v1066_v45, 0.0  ;;  %v801_v63 = vadd.f32 %v769_v55, %v667_v39 }
  0xbf   : > { %v802_v20 = vadd.f32 %v770_v0, %v668_v26  ;;  %v803_v21 = vadd.f32 %v771_v1, %v669_v15  ;;  %v1118_v27 = vpack.c.bf16 %v1102_v31, %v1100_v13  ;;  %v1119_v28 = vpack.c.bf16 %v1103_v17, %v1101_v14  ;;  %559 = vperm.xlu2 %2137, %v2524_v16  }
  0xc0   : > { %2138 = vset.pattern.permute.xlu1 %v2181_v8  ;;  %v766_v1 = vmul.f32 %v2435_v56, %v2403_v42  ;;  %v1099_v13 = vmax.f32 %v1067_v24, 0.0  ;;  %v800_v42 = vadd.f32 %v768_v48, %v666_v9  ;;  %v901_v26 = vmul.f32 %v2461_v5, %v2423_v49  ;;  %v1566_v48 = vld [vmem:[%s2569_s30 + $0x10] sm:$0xff] }
  0xc1   : > { %v936_v41 = vadd.f32 %v904_v38, %v802_v20  ;;  %v937_v43 = vadd.f32 %v905_v10, %v803_v21  ;;  %987 = vperm.xlu1 %2138, %v949_v19   ;;  %1264 = vmatpush.bf16.msra.mxu0 %v1118_v27  ;;  %v1411_v19 = vld [vmem:[%s2482_s22 + $0x8] sm:$0xff] }
  0xc2   : > { %1313 = vmatpush.bf16.msra.mxu1 %v1119_v28  ;;  %1430 = vperm.xlu0 %2135, %v1412_v29   ;;  %v1013_v20 = vpop.permute.xlu2 %1012  ;;  %v934_v21 = vadd.f32 %v902_v37, %v800_v42  ;;  %v935_v28 = vadd.f32 %v903_v30, %v801_v63 }
  0xc3   : > { %v1064_v62 = vadd.f32 %v1023_v18, %v936_v41  ;;  %v1065_v0 = vadd.f32 %v1023_v18, %v937_v43 }
  0xc4   : > { %v610_v23 = vpop.permute.xlu0 %609 }
  0xc5   : > { %v1096_v50 = vmax.f32 %v1064_v62, 0.0  ;;  %v1097_v7 = vmax.f32 %v1065_v0, 0.0  ;;  %v664_v40 = vmul.f32 %v2445_v60, %v610_v23  ;;  %v665_v22 = vmul.f32 %v2449_v61, %v610_v23  ;;  %v944_v0 = vld [vmem:[%s2304_s23] sm:$0xff]  ;;  %v1130_v23 = vld [vmem:[%s2391_s29 + $0x50] sm:$0xff] }
  0xc6   : > { %v2556_v14 = vpop.permute.xlu1 %599 }
  0xc7   : > { %v798_v15 = vadd.f32 %v766_v1, %v664_v40  ;;  %v799_v31 = vadd.f32 %v767_v6, %v665_v22  ;;  %2140 = vset.pattern.permute.xlu2 %v2180_v3  ;;  %v1116_v17 = vpack.c.bf16 %v1098_v12, %v1096_v50  ;;  %v1117_v38 = vpack.c.bf16 %v1099_v13, %v1097_v7  ;;  %v947_v1 = vld [vmem:[%s2304_s23 + $0x18] sm:$0xff]  ;;  %v1133_v7 = vld [vmem:[%s2391_s29 + $0x68] sm:$0xff] }
  0xc8   : > { %681 = vperm.xlu2 %2140, %v2359_v25   ;;  %v1129_v22 = vld [vmem:[%s2391_s29 + $0x48] sm:$0xff]  ;;  %v763_v12 = vmul.f32 %v2439_v57, %v2384_v36  ;;  %v660_v13 = vmul.f32 %v2445_v60, %v2556_v14  ;;  %v661_v42 = vmul.f32 %v2449_v61, %v2556_v14 }
  0xc9   : > { %v932_v10 = vadd.f32 %v900_v11, %v798_v15  ;;  %v933_v18 = vadd.f32 %v901_v26, %v799_v31  ;;  %2139 = vset.pattern.permute.xlu1 %v2180_v3  ;;  %1265 = vmatpush.bf16.msra.mxu0 %v1116_v17  ;;  %v762_v11 = vmul.f32 %v2435_v56, %v2384_v36  ;;  %v1128_v26 = vld [vmem:[%s2391_s29 + $0x40] sm:$0xff] }
  0xca   : > { %1314 = vmatpush.bf16.msra.mxu1 %v1117_v38  ;;  %677 = vperm.xlu1 %2139, %v2524_v16   ;;  %v2579_v6 = vpop.permute.xlu2 %594  ;;  %v896_v15 = vmul.f32 %v2457_v4, %v2532_v35  ;;  %v897_v31 = vmul.f32 %v2461_v5, %v2532_v35  ;;  %v795_v17 = vadd.f32 %v763_v12, %v661_v42 }
  0xcb   : > { %v1060_v27 = vadd.f32 %v1013_v20, %v932_v10  ;;  %v1061_v49 = vadd.f32 %v1013_v20, %v933_v18  ;;  %1425 = vperm.xlu0 %2135, %v1411_v19   ;;  %v794_v36 = vadd.f32 %v762_v11, %v660_v13  ;;  %v662_v18 = vmul.f32 %v2445_v60, %v2499_v34 }
  0xcc   : > { %v1018_v29 = vpop.permute.xlu0 %1017  ;;  %v663_v19 = vmul.f32 %v2449_v61, %v2499_v34 }
  0xcd   : > { %v1062_v32 = vadd.f32 %v1018_v29, %v934_v21  ;;  %v1063_v33 = vadd.f32 %v1018_v29, %v935_v28  ;;  %v1092_v41 = vmax.f32 %v1060_v27, 0.0  ;;  %v1093_v37 = vmax.f32 %v1061_v49, 0.0  ;;  %v1124_v21 = vld [vmem:[%s2391_s29 + $0x20] sm:$0xff] }
  0xce   : > { %v928_v28 = vadd.f32 %v896_v15, %v794_v36  ;;  %v929_v29 = vadd.f32 %v897_v31, %v795_v17 }
  0xcf   : > { %v1094_v43 = vmax.f32 %v1062_v32, 0.0  ;;  %v1095_v45 = vmax.f32 %v1063_v33, 0.0  ;;  %v714_v24 = vpop.permute.xlu1 %713  ;;  %v1127_v32 = vld [vmem:[%s2391_s29 + $0x38] sm:$0xff] }
  0xd0   : > { %2142 = vset.pattern.permute.xlu2 %v2179_v2  ;;  %v764_v38 = vmul.f32 %v2435_v56, %v714_v24  ;;  %v765_v10 = vmul.f32 %v2439_v57, %v714_v24 }
  0xd1   : > { %v1114_v30 = vpack.c.bf16 %v1094_v43, %v1092_v41  ;;  %v1115_v55 = vpack.c.bf16 %v1095_v45, %v1093_v37  ;;  %815 = vperm.xlu2 %2142, %v2359_v25   ;;  %v1135_v25 = vld [vmem:[%s2391_s29 + $0x78] sm:$0xff] }
  0xd2   : > { %2141 = vset.pattern.permute.xlu1 %v2179_v2  ;;  %v796_v27 = vadd.f32 %v764_v38, %v662_v18  ;;  %v797_v49 = vadd.f32 %v765_v10, %v663_v19  ;;  %v892_v38 = vmul.f32 %v2457_v4, %v2408_v44  ;;  %v1415_v10 = vld [vmem:[%s2482_s22 + $0x28] sm:$0xff]  ;;  %v658_v18 = vmul.f32 %v2445_v60, %v2579_v6 }
  0xd3   : > { %1266 = vmatpush.bf16.msra.mxu0 %v1114_v30  ;;  %1580 = vperm.xlu0 %2135, %v1566_v48   ;;  %v2587_v39 = vpop.permute.xlu2 %705  ;;  %v659_v19 = vmul.f32 %v2449_v61, %v2579_v6 }
  0xd4   : > { %811 = vperm.xlu1 %2141, %v2524_v16   ;;  %1315 = vmatpush.bf16.msra.mxu1 %v1115_v55  ;;  %v1134_v16 = vld [vmem:[%s2391_s29 + $0x70] sm:$0xff]  ;;  %v585_v42 = vpop.permute.xlu0 %584 }
  0xd8   : > { %v848_v62 = vpop.permute.xlu1 %847 }
  0xd9   : > { %2144 = vset.pattern.permute.xlu2 %v2181_v8  ;;  %v898_v20 = vmul.f32 %v2457_v4, %v848_v62  ;;  %v899_v35 = vmul.f32 %v2461_v5, %v848_v62 }
  0xda   : > { %962 = vperm.xlu2 %2144, %v944_v0   ;;  %v1123_v0 = vld [vmem:[%s2391_s29 + $0x18] sm:$0xff] }
  0xdb   : > { %2146 = vset.pattern.permute.xlu0 %v2180_v3  ;;  %v930_v37 = vadd.f32 %v898_v20, %v796_v27  ;;  %v931_v43 = vadd.f32 %v899_v35, %v797_v49  ;;  %v761_v20 = vmul.f32 %v2439_v57, %v2587_v39  ;;  %v1414_v35 = vld [vmem:[%s2482_s22 + $0x20] sm:$0xff] }
  0xdc   : > { %2143 = vset.pattern.permute.xlu1 %v2181_v8  ;;  %v1003_v40 = vpop.permute.xlu2 %1002 }
  0xdd   : > { %977 = vperm.xlu1 %2143, %v947_v1   ;;  %v1056_v33 = vadd.f32 %v1003_v40, %v928_v28  ;;  %v1057_v41 = vadd.f32 %v1003_v40, %v929_v29  ;;  %v1416_v40 = vld [vmem:[%s2482_s22 + $0x30] sm:$0xff]  ;;  %v793_v6 = vadd.f32 %v761_v20, %v659_v19 }
  0xdf   : > { %v1088_v48 = vmax.f32 %v1056_v33, 0.0  ;;  %v1089_v30 = vmax.f32 %v1057_v41, 0.0 }
  0xe1   : > { %v2584_v9 = vpop.permute.xlu1 %589 }
  0xe2   : > { %1213 = vperm.xlu2 %2144, %v1135_v25   ;;  %v1122_v25 = vld [vmem:[%s2391_s29 + $0x10] sm:$0xff]  ;;  %v657_v15 = vmul.f32 %v2449_v61, %v2584_v9 }
  0xe4   : > { %v2609_v14 = vpop.permute.xlu2 %579 }
  0xe5   : > { %1208 = vperm.xlu1 %2143, %v1134_v16  }
  0xea   : > { %v702_v50 = vpop.permute.xlu1 %701  ;;  %1188 = vperm.xlu2 %2144, %v1130_v23  }
  0xeb   : > { %v758_v11 = vmul.f32 %v2435_v56, %v702_v50  ;;  %v759_v12 = vmul.f32 %v2439_v57, %v702_v50  ;;  %v893_v50 = vmul.f32 %v2461_v5, %v2408_v44 }
  0xed   : > { %1203 = vperm.xlu1 %2143, %v1133_v7   ;;  %v2620_v1 = vpop.permute.xlu2 %697  ;;  %v791_v36 = vadd.f32 %v759_v12, %v657_v15  ;;  %v654_v15 = vmul.f32 %v2445_v60, %v585_v42 }
  0xef   : > { %v925_v27 = vadd.f32 %v893_v50, %v791_v36  ;;  %v756_v36 = vmul.f32 %v2435_v56, %v2620_v1  ;;  %v652_v50 = vmul.f32 %v2445_v60, %v2609_v14 }
  0xf2   : > { %1183 = vperm.xlu2 %2144, %v1129_v22   ;;  %v1121_v22 = vld [vmem:[%s2391_s29 + $0x8] sm:$0xff] }
  0xf3   : > { %v2601_v63 = vpop.permute.xlu1 %839 }
  0xf4   : > { %v894_v44 = vmul.f32 %v2457_v4, %v2601_v63  ;;  %v895_v49 = vmul.f32 %v2461_v5, %v2601_v63 }
  0xf5   : > { %1178 = vperm.xlu1 %2143, %v1128_v26   ;;  %v656_v26 = vmul.f32 %v2445_v60, %v2584_v9  ;;  %v760_v9 = vmul.f32 %v2435_v56, %v2587_v39 }
  0xf6   : > { %v2627_v13 = vpop.permute.xlu2 %831  ;;  %v927_v39 = vadd.f32 %v895_v49, %v793_v6 }
  0xf7   : > { %v790_v31 = vadd.f32 %v758_v11, %v656_v26  ;;  %v792_v28 = vadd.f32 %v760_v9, %v658_v18  ;;  %v1567_v9 = vld [vmem:[%s2569_s30 + $0x18] sm:$0xff] }
  0xf9   : > { %v926_v33 = vadd.f32 %v894_v44, %v792_v28 }
  0xfa   : > { %1158 = vperm.xlu2 %2144, %v1124_v21   ;;  %v924_v21 = vadd.f32 %v892_v38, %v790_v31  ;;  %v655_v31 = vmul.f32 %v2449_v61, %v585_v42  ;;  %v757_v38 = vmul.f32 %v2439_v57, %v2620_v1  ;;  %v890_v1 = vmul.f32 %v2457_v4, %v2627_v13 }
  0xfd   : > { %1173 = vperm.xlu1 %2143, %v1127_v32   ;;  %v1008_v45 = vpop.permute.xlu1 %1007  ;;  %v993_v32 = vpop.permute.xlu0 %992 }
  0xfe   : > { %v1058_v34 = vadd.f32 %v1008_v45, %v930_v37  ;;  %v1059_v24 = vadd.f32 %v1008_v45, %v931_v43  ;;  %v1052_v41 = vadd.f32 %v993_v32, %v924_v21  ;;  %v1053_v37 = vadd.f32 %v993_v32, %v925_v27  ;;  %v1410_v45 = vld [vmem:[%s2482_s22] sm:$0xff] }
  0xff   : > { %v2651_v29 = vpop.permute.xlu2 %569  ;;  %v789_v21 = vadd.f32 %v757_v38, %v655_v31  ;;  %v891_v27 = vmul.f32 %v2461_v5, %v2627_v13 }
 0x100   : > { %v1090_v55 = vmax.f32 %v1058_v34, 0.0  ;;  %v1091_v62 = vmax.f32 %v1059_v24, 0.0 }
 0x101   : > { %v923_v32 = vadd.f32 %v891_v27, %v789_v21 }
 0x102   : > { %v1112_v16 = vpack.c.bf16 %v1090_v55, %v1088_v48  ;;  %v1113_v23 = vpack.c.bf16 %v1091_v62, %v1089_v30  ;;  %1153 = vperm.xlu2 %2144, %v1123_v0   ;;  %v1413_v48 = vld [vmem:[%s2482_s22 + $0x18] sm:$0xff]  ;;  %v1084_v55 = vmax.f32 %v1052_v41, 0.0  ;;  %v1085_v62 = vmax.f32 %v1053_v37, 0.0 }
 0x104   : > { %1267 = vmatpush.bf16.msra.mxu0 %v1112_v16  ;;  %1316 = vmatpush.bf16.msra.mxu1 %v1113_v23  ;;  %v1565_v23 = vld [vmem:[%s2569_s30 + $0x8] sm:$0xff] }
 0x105   : > { %1148 = vperm.xlu1 %2143, %v1122_v25  }
 0x106   : > { %v694_v7 = vpop.permute.xlu1 %693 }
 0x107   : > { %v754_v12 = vmul.f32 %v2435_v56, %v694_v7  ;;  %v755_v26 = vmul.f32 %v2439_v57, %v694_v7 }
 0x108   : > { %v2655_v16 = vpop.permute.xlu2 %689 }
 0x109   : > { %v786_v42 = vadd.f32 %v754_v12, %v652_v50 }
 0x10a   : > { %1450 = vperm.xlu2 %2144, %v1416_v40  }
 0x10d   : > { %1143 = vperm.xlu1 %2143, %v1121_v22   ;;  %v1564_v22 = vld [vmem:[%s2569_s30] sm:$0xff] }
 0x10f   : > { %v828_v17 = vpop.permute.xlu1 %827 }
 0x110   : > { %v888_v18 = vmul.f32 %v2457_v4, %v828_v17  ;;  %v889_v7 = vmul.f32 %v2461_v5, %v828_v17 }
 0x111   : > { %v983_v11 = vpop.permute.xlu2 %982 }
 0x112   : > { %1445 = vperm.xlu2 %2144, %v1415_v10   ;;  %v653_v10 = vmul.f32 %v2449_v61, %v2609_v14  ;;  %v920_v14 = vadd.f32 %v888_v18, %v786_v42  ;;  %v753_v18 = vmul.f32 %v2439_v57, %v2655_v16 }
 0x114   : > { %v787_v20 = vadd.f32 %v755_v26, %v653_v10  ;;  %v1048_v28 = vadd.f32 %v983_v11, %v920_v14 }
 0x115   : > { %1440 = vperm.xlu1 %2143, %v1414_v35   ;;  %v788_v35 = vadd.f32 %v756_v36, %v654_v15 }
 0x116   : > { %v921_v44 = vadd.f32 %v889_v7, %v787_v20 }
 0x117   : > { %v922_v6 = vadd.f32 %v890_v1, %v788_v35 }
 0x118   : > { %v998_v43 = vpop.permute.xlu1 %997  ;;  %v1049_v17 = vadd.f32 %v983_v11, %v921_v44 }
 0x119   : > { %v1054_v34 = vadd.f32 %v998_v43, %v926_v33  ;;  %v1055_v24 = vadd.f32 %v998_v43, %v927_v39  ;;  %v560_v49 = vpop.permute.xlu2 %559  ;;  %v575_v33 = vpop.permute.xlu0 %574  ;;  %v1080_v43 = vmax.f32 %v1048_v28, 0.0 }
 0x11a   : > { %1420 = vperm.xlu2 %2144, %v1410_v45   ;;  %v1081_v45 = vmax.f32 %v1049_v17, 0.0  ;;  %v650_v11 = vmul.f32 %v2445_v60, %v575_v33  ;;  %v651_v12 = vmul.f32 %v2449_v61, %v575_v33  ;;  %v644_v7 = vmul.f32 %v2445_v60, %v560_v49 }
 0x11b   : > { %v1086_v30 = vmax.f32 %v1054_v34, 0.0  ;;  %v1087_v63 = vmax.f32 %v1055_v24, 0.0 }
 0x11d   : > { %1435 = vperm.xlu1 %2143, %v1413_v48   ;;  %v1110_v0 = vpack.c.bf16 %v1086_v30, %v1084_v55  ;;  %v1111_v25 = vpack.c.bf16 %v1087_v63, %v1085_v62 }
 0x11f   : > { %1268 = vmatpush.bf16.msra.mxu0 %v1110_v0  ;;  %1317 = vmatpush.bf16.msra.mxu1 %v1111_v25  ;;  %v648_v25 = vmul.f32 %v2445_v60, %v2651_v29 }
 0x121   : > { %v686_v40 = vpop.permute.xlu1 %685  ;;  %v565_v63 = vpop.permute.xlu0 %564 }
 0x122   : > { %1575 = vperm.xlu2 %2144, %v1565_v23   ;;  %v682_v13 = vpop.permute.xlu2 %681  ;;  %v750_v62 = vmul.f32 %v2435_v56, %v686_v40  ;;  %v751_v0 = vmul.f32 %v2439_v57, %v686_v40  ;;  %v884_v23 = vmul.f32 %v2457_v4, %v2420_v47  ;;  %v646_v40 = vmul.f32 %v2445_v60, %v565_v63 }
 0x123   : > { %v647_v36 = vmul.f32 %v2449_v61, %v565_v63  ;;  %v748_v42 = vmul.f32 %v2435_v56, %v682_v13  ;;  %v749_v20 = vmul.f32 %v2439_v57, %v682_v13 }
 0x124   : > { %v782_v26 = vadd.f32 %v750_v62, %v648_v25 }
 0x125   : > { %1570 = vperm.xlu1 %2143, %v1564_v22   ;;  %v885_v22 = vmul.f32 %v2461_v5, %v2420_v47  ;;  %v752_v47 = vmul.f32 %v2435_v56, %v2655_v16  ;;  %v780_v17 = vadd.f32 %v748_v42, %v646_v40  ;;  %v2061_v40 = vld [vmem:[%s2892_s6] sm:$0xff] }
 0x126   : > { %v916_v1 = vadd.f32 %v884_v23, %v782_v26 }
 0x129   : > { %v973_v10 = vpop.permute.xlu0 %972 }
 0x12a   : > { %v824_v19 = vpop.permute.xlu1 %823  ;;  %2145 = vset.pattern.permute.xlu2 %v2180_v3  ;;  %v1044_v33 = vadd.f32 %v973_v10, %v916_v1 }
 0x12b   : > { %v816_v31 = vpop.permute.xlu2 %815  ;;  %v886_v14 = vmul.f32 %v2457_v4, %v824_v19  ;;  %v887_v44 = vmul.f32 %v2461_v5, %v824_v19 }
 0x12c   : > { %v882_v16 = vmul.f32 %v2457_v4, %v816_v31  ;;  %v883_v60 = vmul.f32 %v2461_v5, %v816_v31  ;;  %v1076_v13 = vmax.f32 %v1044_v33, 0.0 }
 0x12d   : > { %1585 = vperm.xlu1 %2143, %v1567_v9   ;;  %v645_v9 = vmul.f32 %v2449_v61, %v560_v49  ;;  %v784_v49 = vadd.f32 %v752_v47, %v650_v11 }
 0x133   : > { %v988_v39 = vpop.permute.xlu1 %987 }
 0x134   : > { %v1050_v41 = vadd.f32 %v988_v39, %v922_v6  ;;  %v1051_v37 = vadd.f32 %v988_v39, %v923_v32 }
 0x135   : > { %2147 = vset.pattern.permute.xlu1 %v2180_v3  ;;  %v649_v3 = vmul.f32 %v2449_v61, %v2651_v29 }
 0x136   : > { %v1082_v34 = vmax.f32 %v1050_v41, 0.0  ;;  %v1083_v24 = vmax.f32 %v1051_v37, 0.0  ;;  %v914_v41 = vadd.f32 %v882_v16, %v780_v17 }
 0x137   : > { %v783_v15 = vadd.f32 %v751_v0, %v649_v3 }
 0x138   : > { %v1108_v48 = vpack.c.bf16 %v1082_v34, %v1080_v43  ;;  %v1109_v30 = vpack.c.bf16 %v1083_v24, %v1081_v45  ;;  %v918_v43 = vadd.f32 %v886_v14, %v784_v49  ;;  %v963_v34 = vpop.permute.xlu2 %962 }
 0x139   : > { %v917_v27 = vadd.f32 %v885_v22, %v783_v15 }
 0x13a   : > { %1269 = vmatpush.bf16.msra.mxu0 %v1108_v48  ;;  %1318 = vmatpush.bf16.msra.mxu1 %v1109_v30  ;;  %v968_v30 = vpop.permute.xlu0 %967 }
 0x13b   : > { %v1045_v39 = vadd.f32 %v973_v10, %v917_v27  ;;  %v1042_v0 = vadd.f32 %v968_v30, %v914_v41  ;;  %v2066_v10 = vld [vmem:[%s2892_s6 + $0x28] sm:$0xff] }
 0x13c   : > { %v678_v55 = vpop.permute.xlu1 %677 }
 0x13d   : > { %v746_v38 = vmul.f32 %v2435_v56, %v678_v55  ;;  %v747_v29 = vmul.f32 %v2439_v57, %v678_v55  ;;  %v785_v56 = vadd.f32 %v753_v18, %v651_v12  ;;  %v781_v57 = vadd.f32 %v749_v20, %v647_v36  ;;  %v2062_v36 = vld [vmem:[%s2892_s6 + $0x8] sm:$0xff] }
 0x13e   : > { %v1077_v63 = vmax.f32 %v1045_v39, 0.0  ;;  %v1074_v12 = vmax.f32 %v1042_v0, 0.0 }
 0x13f   : > { %v778_v28 = vadd.f32 %v746_v38, %v644_v7  ;;  %v779_v61 = vadd.f32 %v747_v29, %v645_v9  ;;  %v915_v37 = vadd.f32 %v883_v60, %v781_v57  ;;  %v919_v45 = vadd.f32 %v887_v44, %v785_v56  ;;  %v2063_v38 = vld [vmem:[%s2892_s6 + $0x10] sm:$0xff]  ;;  %v2064_v29 = vld [vmem:[%s2892_s6 + $0x18] sm:$0xff] }
 0x140   : > { %v2067_v9 = vld [vmem:[%s2892_s6 + $0x30] sm:$0xff] }
 0x141   : > { %v1043_v25 = vadd.f32 %v968_v30, %v915_v37 }
 0x142   : > { %v2730_v18 = vpop.permute.xlu0 %1198 }
 0x143   : > { %v1075_v26 = vmax.f32 %v1043_v25, 0.0 }
 0x146   : > { %v812_v50 = vpop.permute.xlu1 %811 }
 0x147   : > { %v880_v35 = vmul.f32 %v2457_v4, %v812_v50  ;;  %v881_v21 = vmul.f32 %v2461_v5, %v812_v50  ;;  %v2065_v50 = vld [vmem:[%s2892_s6 + $0x20] sm:$0xff] }
 0x149   : > { %v912_v6 = vadd.f32 %v880_v35, %v778_v28  ;;  %v913_v32 = vadd.f32 %v881_v21, %v779_v61  ;;  %v2741_v35 = vpop.permute.xlu2 %1213  ;;  %v2068_v21 = vld [vmem:[%s2892_s6 + $0x38] sm:$0xff] }
 0x14a   : > { %v2737_v42 = vpop.permute.xlu0 %1193 }
 0x14b   : > { %v1040_v48 = vadd.f32 %v963_v34, %v912_v6  ;;  %v1041_v5 = vadd.f32 %v963_v34, %v913_v32 }
 0x14d   : > { %v1072_v22 = vmax.f32 %v1040_v48, 0.0  ;;  %v1073_v11 = vmax.f32 %v1041_v5, 0.0 }
 0x14f   : > { %v978_v19 = vpop.permute.xlu1 %977  ;;  %v1104_v15 = vpack.c.bf16 %v1074_v12, %v1072_v22  ;;  %v1105_v31 = vpack.c.bf16 %v1075_v26, %v1073_v11 }
 0x150   : > { %v1046_v24 = vadd.f32 %v978_v19, %v918_v43  ;;  %v1047_v4 = vadd.f32 %v978_v19, %v919_v45 }
 0x151   : > { %v2746_v14 = vpop.permute.xlu2 %1188 }
 0x152   : > { %v1078_v55 = vmax.f32 %v1046_v24, 0.0  ;;  %v1079_v62 = vmax.f32 %v1047_v4, 0.0  ;;  %v1169_v1 = vpop.permute.xlu0 %1168 }
 0x154   : > { %v1106_v3 = vpack.c.bf16 %v1078_v55, %v1076_v13  ;;  %v1107_v23 = vpack.c.bf16 %v1079_v62, %v1077_v63 }
 0x156   : > { %1270 = vmatpush.bf16.msra.mxu0 %v1106_v3  ;;  %1319 = vmatpush.bf16.msra.mxu1 %v1107_v23 }
 0x157   : > { %v2728_v47 = vpop.permute.xlu1 %1208 }
 0x159   : > { %v2748_v61 = vpop.permute.xlu2 %1183 }
 0x15a   : > { %1271 = vmatpush.bf16.msra.mxu0 %v1104_v15  ;;  %1320 = vmatpush.bf16.msra.mxu1 %v1105_v31  ;;  %v1164_v44 = vpop.permute.xlu0 %1163 }
 0x15d   : > { %1272 = vmatmul.bf16.vlgmr.msra.gmra.mxu0 %v2061_v40  ;;  %1321 = vmatmul.bf16.vlgmr.msra.gmra.mxu1 %v2061_v40 }
 0x15f   : > { %v2732_v7 = vpop.permute.xlu1 %1203 }
 0x161   : > { %v1159_v34 = vpop.permute.xlu2 %1158 }
 0x162   : > { %v1139_v49 = vpop.permute.xlu0 %1138 }
 0x167   : > { %v2739_v20 = vpop.permute.xlu1 %1178 }
 0x169   : > { %v1154_v5 = vpop.permute.xlu2 %1153 }
 0x16d   : > { %1277 = vmatmul.bf16.gmra.mxu0 %v2062_v36  ;;  %1326 = vmatmul.bf16.gmra.mxu1 %v2062_v36 }
 0x16f   : > { %v1174_v27 = vpop.permute.xlu1 %1173 }
 0x177   : > { %v1149_v16 = vpop.permute.xlu1 %1148 }
 0x17d   : > { %1282 = vmatmul.bf16.gmra.mxu0 %v2063_v38  ;;  %1331 = vmatmul.bf16.gmra.mxu1 %v2063_v38 }
 0x17f   : > { %v1144_v56 = vpop.permute.xlu1 %1143 }
 0x18d   : > { %1287 = vmatmul.bf16.gmra.mxu0 %v2064_v29  ;;  %1336 = vmatmul.bf16.gmra.mxu1 %v2064_v29 }
 0x19d   : > { %1292 = vmatmul.bf16.gmra.mxu0 %v2065_v50  ;;  %1341 = vmatmul.bf16.gmra.mxu1 %v2065_v50 }
 0x1ad   : > { %1297 = vmatmul.bf16.gmra.mxu0 %v2066_v10  ;;  %1346 = vmatmul.bf16.gmra.mxu1 %v2066_v10 }
 0x1bd   : > { %1302 = vmatmul.bf16.gmra.mxu0 %v2067_v9  ;;  %1351 = vmatmul.bf16.gmra.mxu1 %v2067_v9 }
 0x1cd   : > { %1307 = vmatmul.bf16.gmra.mxu0 %v2068_v21  ;;  %1356 = vmatmul.bf16.gmra.mxu1 %v2068_v21 }
 0x1da   : > { %v1273_v60 = vpop.f32.mrf.mxu0  ;;  %v1322_v28 = vpop.f32.mrf.mxu1 }
 0x1db   : > { %v1274_v17 = vadd.f32 %v1273_v60, %v1139_v49  ;;  %v1323_v57 = vadd.f32 %v1322_v28, %v1139_v49 }
 0x1dd   : > { %v1362_v41 = vmax.f32 %v1274_v17, 0.0  ;;  %v1363_v37 = vmax.f32 %v1323_v57, 0.0 }
 0x1e2   : > { %v1275_v6 = vpop.f32.mrf.mxu0  ;;  %v1324_v32 = vpop.f32.mrf.mxu1 }
 0x1e3   : > { %v1276_v33 = vadd.f32 %v1275_v6, %v1144_v56  ;;  %v1325_v39 = vadd.f32 %v1324_v32, %v1144_v56 }
 0x1e5   : > { %v1364_v43 = vmax.f32 %v1276_v33, 0.0  ;;  %v1365_v45 = vmax.f32 %v1325_v39, 0.0 }
 0x1e7   : > { %v2750_v19 = vpack.c.bf16 %v1364_v43, %v1362_v41  ;;  %v2752_v24 = vpack.c.bf16 %v1365_v45, %v1363_v37 }
 0x1ea   : > { %v1278_v4 = vpop.f32.mrf.mxu0  ;;  %v1327_v48 = vpop.f32.mrf.mxu1 }
 0x1eb   : > { %v1279_v30 = vadd.f32 %v1278_v4, %v1149_v16  ;;  %v1328_v13 = vadd.f32 %v1327_v48, %v1149_v16 }
 0x1ed   : > { %v1366_v25 = vmax.f32 %v1279_v30, 0.0  ;;  %v1367_v3 = vmax.f32 %v1328_v13, 0.0 }
 0x1f2   : > { %v1280_v63 = vpop.f32.mrf.mxu0  ;;  %v1329_v55 = vpop.f32.mrf.mxu1 }
 0x1f3   : > { %v1281_v62 = vadd.f32 %v1280_v63, %v1154_v5  ;;  %v1330_v0 = vadd.f32 %v1329_v55, %v1154_v5 }
 0x1f5   : > { %v1368_v23 = vmax.f32 %v1281_v62, 0.0  ;;  %v1369_v22 = vmax.f32 %v1330_v0, 0.0 }
 0x1f7   : > { %v2754_v11 = vpack.c.bf16 %v1368_v23, %v1366_v25  ;;  %v2756_v12 = vpack.c.bf16 %v1369_v22, %v1367_v3 }
 0x1fa   : > { %v1283_v26 = vpop.f32.mrf.mxu0  ;;  %v1332_v15 = vpop.f32.mrf.mxu1 }
 0x1fb   : > { %v1284_v31 = vadd.f32 %v1283_v26, %v1159_v34  ;;  %v1333_v40 = vadd.f32 %v1332_v15, %v1159_v34 }
 0x1fd   : > { %v1370_v10 = vmax.f32 %v1284_v31, 0.0  ;;  %v1371_v9 = vmax.f32 %v1333_v40, 0.0 }
 0x202   : > { %v1285_v36 = vpop.f32.mrf.mxu0  ;;  %v1334_v38 = vpop.f32.mrf.mxu1 }
 0x203   : > { %v1286_v29 = vadd.f32 %v1285_v36, %v1164_v44  ;;  %v1335_v50 = vadd.f32 %v1334_v38, %v1164_v44 }
 0x205   : > { %v1372_v21 = vmax.f32 %v1286_v29, 0.0  ;;  %v1373_v16 = vmax.f32 %v1335_v50, 0.0 }
 0x207   : > { %v2758_v60 = vpack.c.bf16 %v1372_v21, %v1370_v10  ;;  %v2760_v28 = vpack.c.bf16 %v1373_v16, %v1371_v9 }
 0x20a   : > { %v1288_v49 = vpop.f32.mrf.mxu0  ;;  %v1337_v56 = vpop.f32.mrf.mxu1 }
 0x20b   : > { %v1289_v17 = vadd.f32 %v1288_v49, %v1169_v1  ;;  %v1338_v57 = vadd.f32 %v1337_v56, %v1169_v1 }
 0x20d   : > { %v1374_v41 = vmax.f32 %v1289_v17, 0.0  ;;  %v1375_v37 = vmax.f32 %v1338_v57, 0.0 }
 0x212   : > { %v1290_v6 = vpop.f32.mrf.mxu0  ;;  %v1339_v32 = vpop.f32.mrf.mxu1 }
 0x213   : > { %v1291_v33 = vadd.f32 %v1290_v6, %v1174_v27  ;;  %v1340_v39 = vadd.f32 %v1339_v32, %v1174_v27 }
 0x215   : > { %v1376_v43 = vmax.f32 %v1291_v33, 0.0  ;;  %v1377_v44 = vmax.f32 %v1340_v39, 0.0 }
 0x217   : > { %v2762_v45 = vpack.c.bf16 %v1376_v43, %v1374_v41  ;;  %v2764_v34 = vpack.c.bf16 %v1377_v44, %v1375_v37 }
 0x21a   : > { %v1293_v4 = vpop.f32.mrf.mxu0  ;;  %v1342_v48 = vpop.f32.mrf.mxu1 }
 0x222   : > { %v1295_v5 = vpop.f32.mrf.mxu0  ;;  %v1344_v30 = vpop.f32.mrf.mxu1 }
 0x223   : > { %v1345_v41 = vadd.f32 %v1344_v30, %v2748_v61 }
 0x22a   : > { %v1298_v13 = vpop.f32.mrf.mxu0  ;;  %v1347_v63 = vpop.f32.mrf.mxu1 }
 0x22b   : > { %v1299_v32 = vadd.f32 %v1298_v13, %v2746_v14 }
 0x232   : > { %v1300_v55 = vpop.f32.mrf.mxu0  ;;  %v1349_v1 = vpop.f32.mrf.mxu1 }
 0x233   : > { %v1350_v56 = vadd.f32 %v1349_v1, %v2737_v42  ;;  %v1343_v1 = vadd.f32 %v1342_v48, %v2739_v20 }
 0x235   : > { %v1385_v43 = vmax.f32 %v1350_v56, 0.0 }
 0x23a   : > { %v1303_v62 = vpop.f32.mrf.mxu0  ;;  %v1352_v0 = vpop.f32.mrf.mxu1 }
 0x23b   : > { %v1304_v50 = vadd.f32 %v1303_v62, %v2730_v18  ;;  %v1353_v10 = vadd.f32 %v1352_v0, %v2730_v18  ;;  %v1296_v18 = vadd.f32 %v1295_v5, %v2748_v61  ;;  %v1382_v62 = vmax.f32 %v1299_v32, 0.0 }
 0x23c   : > { %v1379_v5 = vmax.f32 %v1343_v1, 0.0 }
 0x23d   : > { %v1386_v33 = vmax.f32 %v1304_v50, 0.0  ;;  %v1387_v39 = vmax.f32 %v1353_v10, 0.0  ;;  %v1441_v10 = vpop.permute.xlu1 %1440 }
 0x242   : > { %v1305_v25 = vpop.f32.mrf.mxu0  ;;  %v1354_v27 = vpop.f32.mrf.mxu1 }
 0x243   : > { %v1306_v40 = vadd.f32 %v1305_v25, %v2732_v7  ;;  %v1355_v36 = vadd.f32 %v1354_v27, %v2732_v7 }
 0x245   : > { %v1388_v17 = vmax.f32 %v1306_v40, 0.0  ;;  %v1389_v57 = vmax.f32 %v1355_v36, 0.0  ;;  %v1451_v40 = vpop.permute.xlu2 %1450  ;;  %v2809_v36 = vld [vmem:[%s2895_s9 + $0x10] sm:$0xff] }
 0x246   : > { %1730 = vperm.xlu1 %2147, %v2809_v36  }
 0x247   : > { %v1406_v44 = vpack.c.bf16 %v1388_v17, %v1386_v33  ;;  %v1436_v33 = vpop.permute.xlu1 %1435 }
 0x24a   : > { %v1308_v3 = vpop.f32.mrf.mxu0  ;;  %v1357_v23 = vpop.f32.mrf.mxu1 }
 0x24b   : > { %v1309_v22 = vadd.f32 %v1308_v3, %v2728_v47  ;;  %v1358_v26 = vadd.f32 %v1357_v23, %v2728_v47  ;;  %v1301_v47 = vadd.f32 %v1300_v55, %v2737_v42  ;;  %v1407_v42 = vpack.c.bf16 %v1389_v57, %v1387_v39 }
 0x24c   : > { %v1294_v55 = vadd.f32 %v1293_v4, %v2739_v20  ;;  %v2069_v20 = vld [vmem:[%s2893_s7] sm:$0xff] }
 0x24d   : > { %v1390_v9 = vmax.f32 %v1309_v22, 0.0  ;;  %v1391_v21 = vmax.f32 %v1358_v26, 0.0  ;;  %v1384_v37 = vmax.f32 %v1301_v47, 0.0 }
 0x24e   : > { %v1378_v27 = vmax.f32 %v1294_v55, 0.0  ;;  %2148 = vset.pattern.permute.xlu1 %v2179_v2 }
 0x24f   : > { %v1404_v0 = vpack.c.bf16 %v1384_v37, %v1382_v62 }
 0x252   : > { %v1310_v15 = vpop.f32.mrf.mxu0  ;;  %v1359_v31 = vpop.f32.mrf.mxu1 }
 0x253   : > { %v1311_v38 = vadd.f32 %v1310_v15, %v2741_v35  ;;  %v1360_v29 = vadd.f32 %v1359_v31, %v2741_v35  ;;  %v1348_v35 = vadd.f32 %v1347_v63, %v2746_v14  ;;  %v1380_v14 = vmax.f32 %v1296_v18, 0.0  ;;  %v1456_v31 = vpop.permute.xlu0 %1455 }
 0x254   : > { %v1381_v63 = vmax.f32 %v1345_v41, 0.0 }
 0x255   : > { %v1392_v16 = vmax.f32 %v1311_v38, 0.0  ;;  %v1393_v49 = vmax.f32 %v1360_v29, 0.0  ;;  %v1383_v13 = vmax.f32 %v1348_v35, 0.0  ;;  %v1402_v61 = vpack.c.bf16 %v1380_v14, %v1378_v27  ;;  %v2814_v38 = vld [vmem:[%s2895_s9] sm:$0xff]  ;;  %v552_v14 = vld [vmem:[%s2895_s9 + $0x8] sm:$0xff] }
 0x256   : > { %v1403_v30 = vpack.c.bf16 %v1381_v63, %v1379_v5  ;;  %1722 = vperm.xlu2 %2145, %v2814_v38   ;;  %1781 = vperm.xlu1 %2148, %v2814_v38  }
 0x257   : > { %v1408_v6 = vpack.c.bf16 %v1392_v16, %v1390_v9  ;;  %v1409_v7 = vpack.c.bf16 %v1393_v49, %v1391_v21  ;;  %v1405_v25 = vpack.c.bf16 %v1385_v43, %v1383_v13  ;;  %v1446_v21 = vpop.permute.xlu2 %1445  ;;  %v554_v13 = vld [vmem:[%s2895_s9 + $0x18] sm:$0xff]  ;;  %1726 = vperm.xlu0 %2146, %v552_v14  }
 0x259   : > { %1482 = vmatpush.bf16.msra.mxu2 %v1408_v6  ;;  %1511 = vmatpush.bf16.msra.mxu3 %v1409_v7 }
 0x25b   : > { %v1431_v9 = vpop.permute.xlu0 %1430 }
 0x25d   : > { %1483 = vmatpush.bf16.msra.mxu2 %v1406_v44  ;;  %1512 = vmatpush.bf16.msra.mxu3 %v1407_v42 }
 0x25e   : > { %1793 = vperm.xlu1 %2148, %v554_v13   ;;  %1734 = vperm.xlu2 %2145, %v554_v13  }
 0x25f   : > { %2150 = vset.pattern.permute.xlu0 %v2179_v2 }
 0x260   : > { %1789 = vperm.xlu0 %2150, %v2809_v36  }
 0x261   : > { %1484 = vmatpush.bf16.msra.mxu2 %v1404_v0  ;;  %1513 = vmatpush.bf16.msra.mxu3 %v1405_v25 }
 0x263   : > { %v1426_v63 = vpop.permute.xlu0 %1425 }
 0x265   : > { %1485 = vmatpush.bf16.msra.mxu2 %v1402_v61  ;;  %1514 = vmatpush.bf16.msra.mxu3 %v1403_v30 }
 0x266   : > { %2152 = vset.pattern.permute.xlu1 %v2181_v8  ;;  %2149 = vset.pattern.permute.xlu2 %v2179_v2 }
 0x267   : > { %1658 = vperm.xlu1 %2152, %v552_v14   ;;  %1785 = vperm.xlu2 %2149, %v552_v14  }
 0x268   : > { %2153 = vset.pattern.permute.xlu0 %v2181_v8 }
 0x269   : > { %1486 = vmatpush.bf16.msra.mxu2 %v2762_v45  ;;  %1515 = vmatpush.bf16.msra.mxu3 %v2764_v34 }
 0x26a   : > { %1668 = vperm.xlu0 %2153, %v554_v13  }
 0x26d   : > { %1487 = vmatpush.bf16.msra.mxu2 %v2758_v60  ;;  %1516 = vmatpush.bf16.msra.mxu3 %v2760_v28  ;;  %v2070_v60 = vld [vmem:[%s2893_s7 + $0x8] sm:$0xff] }
 0x26f   : > { %2151 = vset.pattern.permute.xlu2 %v2181_v8  ;;  %v1581_v8 = vpop.permute.xlu0 %1580 }
 0x270   : > { %1653 = vperm.xlu2 %2151, %v2814_v38  }
 0x271   : > { %1488 = vmatpush.bf16.msra.mxu2 %v2754_v11  ;;  %1517 = vmatpush.bf16.msra.mxu3 %v2756_v12  ;;  %v2071_v11 = vld [vmem:[%s2893_s7 + $0x10] sm:$0xff] }
 0x272   : > { %2154 = vset.pattern.permute.xlu0 %v2179_v2 }
 0x275   : > { %1489 = vmatpush.bf16.msra.mxu2 %v2750_v19  ;;  %1518 = vmatpush.bf16.msra.mxu3 %v2752_v24  ;;  %v2072_v19 = vld [vmem:[%s2893_s7 + $0x18] sm:$0xff] }
 0x278   : > { %1490 = vmatmul.bf16.vlgmr.msra.gmra.mxu2 %v2069_v20  ;;  %1519 = vmatmul.bf16.vlgmr.msra.gmra.mxu3 %v2069_v20 }
 0x279   : > { %1663 = vperm.xlu2 %2151, %v2809_v36  }
 0x288   : > { %1495 = vmatmul.bf16.gmra.mxu2 %v2070_v60  ;;  %1524 = vmatmul.bf16.gmra.mxu3 %v2070_v60 }
 0x298   : > { %1500 = vmatmul.bf16.gmra.mxu2 %v2071_v11  ;;  %1529 = vmatmul.bf16.gmra.mxu3 %v2071_v11 }
 0x2a8   : > { %1505 = vmatmul.bf16.gmra.mxu2 %v2072_v19  ;;  %1534 = vmatmul.bf16.gmra.mxu3 %v2072_v19 }
 0x2fb   : > { %v2802_v24 = vpop.f32.mrf.mxu2  ;;  %v2804_v12 = vpop.f32.mrf.mxu3 }
 0x303   : > { %v1493_v28 = vpop.f32.mrf.mxu2  ;;  %v1522_v45 = vpop.f32.mrf.mxu3 }
 0x304   : > { %v1494_v61 = vadd.f32 %v1493_v28, %v1426_v63  ;;  %v1523_v30 = vadd.f32 %v1522_v45, %v1426_v63 }
 0x30b   : > { %v1496_v34 = vpop.f32.mrf.mxu2  ;;  %v1525_v4 = vpop.f32.mrf.mxu3 }
 0x30c   : > { %v1497_v0 = vadd.f32 %v1496_v34, %v1431_v9  ;;  %v1526_v25 = vadd.f32 %v1525_v4, %v1431_v9 }
 0x30e   : > { %v1544_v34 = vmax.f32 %v1497_v0, 0.0  ;;  %v1545_v4 = vmax.f32 %v1526_v25, 0.0 }
 0x313   : > { %v1498_v48 = vpop.f32.mrf.mxu2  ;;  %v1527_v3 = vpop.f32.mrf.mxu3 }
 0x314   : > { %v1499_v43 = vadd.f32 %v1498_v48, %v1436_v33  ;;  %v1528_v44 = vadd.f32 %v1527_v3, %v1436_v33  ;;  %v1421_v48 = vpop.permute.xlu2 %1420 }
 0x315   : > { %v1492_v3 = vadd.f32 %v2802_v24, %v1421_v48 }
 0x316   : > { %v1546_v20 = vmax.f32 %v1499_v43, 0.0  ;;  %v1547_v60 = vmax.f32 %v1528_v44, 0.0 }
 0x318   : > { %v1558_v28 = vpack.c.bf16 %v1546_v20, %v1544_v34  ;;  %v1559_v45 = vpack.c.bf16 %v1547_v60, %v1545_v4 }
 0x31b   : > { %v1501_v23 = vpop.f32.mrf.mxu2  ;;  %v1530_v22 = vpop.f32.mrf.mxu3 }
 0x31c   : > { %v1502_v32 = vadd.f32 %v1501_v23, %v1441_v10  ;;  %v1531_v35 = vadd.f32 %v1530_v22, %v1441_v10  ;;  %v1521_v23 = vadd.f32 %v2804_v12, %v1421_v48  ;;  %v1542_v22 = vmax.f32 %v1494_v61, 0.0  ;;  %v2073_v12 = vld [vmem:[%s2894_s8] sm:$0xff]  ;;  %v1571_v10 = vpop.permute.xlu1 %1570  ;;  %v1576_v9 = vpop.permute.xlu2 %1575 }
 0x31e   : > { %v1548_v27 = vmax.f32 %v1502_v32, 0.0  ;;  %v1549_v5 = vmax.f32 %v1531_v35, 0.0 }
 0x323   : > { %v1503_v26 = vpop.f32.mrf.mxu2  ;;  %v1532_v15 = vpop.f32.mrf.mxu3 }
 0x324   : > { %v1504_v17 = vadd.f32 %v1503_v26, %v1446_v21  ;;  %v1533_v57 = vadd.f32 %v1532_v15, %v1446_v21  ;;  %v1543_v26 = vmax.f32 %v1523_v30, 0.0  ;;  %v1540_v15 = vmax.f32 %v1492_v3, 0.0  ;;  %v1586_v21 = vpop.permute.xlu1 %1585 }
 0x326   : > { %v1550_v42 = vmax.f32 %v1504_v17, 0.0  ;;  %v1551_v55 = vmax.f32 %v1533_v57, 0.0 }
 0x328   : > { %v1560_v11 = vpack.c.bf16 %v1550_v42, %v1548_v27  ;;  %v1561_v19 = vpack.c.bf16 %v1551_v55, %v1549_v5 }
 0x32b   : > { %v1506_v29 = vpop.f32.mrf.mxu2  ;;  %v1535_v50 = vpop.f32.mrf.mxu3 }
 0x32c   : > { %v1507_v16 = vadd.f32 %v1506_v29, %v1451_v40  ;;  %v1536_v49 = vadd.f32 %v1535_v50, %v1451_v40  ;;  %v1556_v40 = vpack.c.bf16 %v1542_v22, %v1540_v15  ;;  %v555_v29 = vld [vmem:[%s2896_s10] sm:$0x7]  ;;  %v2074_v50 = vld [vmem:[%s2894_s8 + $0x8] sm:$0xff] }
 0x32d   : > { %1699 = vperm.xlu1 %2152, %v555_v29  }
 0x32e   : > { %v1552_v39 = vmax.f32 %v1507_v16, 0.0  ;;  %v1553_v18 = vmax.f32 %v1536_v49, 0.0  ;;  %v1723_v16 = vpop.permute.xlu2 %1722  ;;  %v1731_v49 = vpop.permute.xlu1 %1730 }
 0x333   : > { %v1508_v47 = vpop.f32.mrf.mxu2  ;;  %v1537_v56 = vpop.f32.mrf.mxu3 }
 0x334   : > { %v1509_v6 = vadd.f32 %v1508_v47, %v1456_v31  ;;  %v1538_v7 = vadd.f32 %v1537_v56, %v1456_v31  ;;  %v1541_v31 = vmax.f32 %v1521_v23, 0.0 }
 0x336   : > { %v1554_v41 = vmax.f32 %v1509_v6, 0.0  ;;  %v1555_v37 = vmax.f32 %v1538_v7, 0.0  ;;  %v1557_v24 = vpack.c.bf16 %v1543_v26, %v1541_v31  ;;  %v2846_v47 = vpop.permute.xlu2 %1734  ;;  %v1782_v56 = vpop.permute.xlu1 %1781 }
 0x337   : > { %v1727_v6 = vpop.permute.xlu0 %1726 }
 0x338   : > { %v1562_v1 = vpack.c.bf16 %v1554_v41, %v1552_v39  ;;  %v1563_v62 = vpack.c.bf16 %v1555_v37, %v1553_v18 }
 0x33a   : > { %1609 = vmatpush.bf16.msrb.mxu2 %v1562_v1  ;;  %1628 = vmatpush.bf16.msrb.mxu3 %v1563_v62 }
 0x33e   : > { %1610 = vmatpush.bf16.msrb.mxu2 %v1560_v11  ;;  %1629 = vmatpush.bf16.msrb.mxu3 %v1561_v19  ;;  %v1786_v57 = vpop.permute.xlu2 %1785  ;;  %v1794_v36 = vpop.permute.xlu1 %1793 }
 0x33f   : > { %v1790_v62 = vpop.permute.xlu0 %1789 }
 0x342   : > { %1611 = vmatpush.bf16.msrb.mxu2 %v1558_v28  ;;  %1630 = vmatpush.bf16.msrb.mxu3 %v1559_v45 }
 0x346   : > { %1612 = vmatpush.bf16.msrb.mxu2 %v1556_v40  ;;  %1631 = vmatpush.bf16.msrb.mxu3 %v1557_v24  ;;  %v1654_v18 = vpop.permute.xlu2 %1653  ;;  %v1659_v14 = vpop.permute.xlu1 %1658 }
 0x349   : > { %2047 = vmatmul.msk.bf16.vlgmr.msrb.gmra.mxu2 %vm1598_vm0, %v2073_v12  ;;  %2049 = vmatmul.msk.bf16.vlgmr.msrb.gmra.mxu3 %vm1598_vm0, %v2073_v12 }
 0x34e   : > { %v1664_v34 = vpop.permute.xlu2 %1663 }
 0x359   : > { %2048 = vmatmul.msk.bf16.gmra.mxu2 %vm1598_vm0, %v2074_v50  ;;  %2050 = vmatmul.msk.bf16.gmra.mxu3 %vm1598_vm0, %v2074_v50 }
 0x3cc   : > { %v1614_v38 = vpop.f32.mrf.mxu2  ;;  %v1633_v17 = vpop.f32.mrf.mxu3 }
 0x3cd   : > { %v1615_v35 = vadd.f32 %v1614_v38, %v1571_v10  ;;  %v1634_v39 = vadd.f32 %v1633_v17, %v1571_v10  ;;  %v1669_v17 = vpop.permute.xlu0 %1668 }
 0x3cf   : > { %v1643_v41 = vmax.f32 %v1615_v35, 0.0  ;;  %v1644_v13 = vmax.f32 %v1634_v39, 0.0 }
 0x3d1   : > { %v1737_v25 = vmul.f32 %v1723_v16, %v1643_v41  ;;  %v1796_v27 = vmul.f32 %v1782_v56, %v1643_v41  ;;  %v1738_v30 = vmul.f32 %v1723_v16, %v1644_v13  ;;  %v1797_v20 = vmul.f32 %v1782_v56, %v1644_v13 }
 0x3d2   : > { %v1671_v19 = vmul.f32 %v1654_v18, %v1643_v41  ;;  %v1672_v48 = vmul.f32 %v1654_v18, %v1644_v13 }
 0x3d4   : > { %v1616_v7 = vpop.f32.mrf.mxu2  ;;  %v1635_v32 = vpop.f32.mrf.mxu3 }
 0x3d5   : > { %v1617_v2 = vadd.f32 %v1616_v7, %v1576_v9  ;;  %v1636_v33 = vadd.f32 %v1635_v32, %v1576_v9 }
 0x3d7   : > { %v1645_v44 = vmax.f32 %v1617_v2, 0.0  ;;  %v1646_v42 = vmax.f32 %v1636_v33, 0.0 }
 0x3d9   : > { %v1798_v5 = vmul.f32 %v1786_v57, %v1645_v44  ;;  %v1799_v61 = vmul.f32 %v1786_v57, %v1646_v42  ;;  %v1739_v60 = vmul.f32 %v1727_v6, %v1645_v44  ;;  %v1740_v11 = vmul.f32 %v1727_v6, %v1646_v42 }
 0x3da   : > { %v1673_v3 = vmul.f32 %v1659_v14, %v1645_v44  ;;  %v1674_v23 = vmul.f32 %v1659_v14, %v1646_v42 }
 0x3db   : > { %v1804_v31 = vadd.f32 %v1798_v5, %v1796_v27  ;;  %v1813_v40 = vadd.f32 %v1799_v61, %v1797_v20  ;;  %v1745_v29 = vadd.f32 %v1739_v60, %v1737_v25  ;;  %v1754_v50 = vadd.f32 %v1740_v11, %v1738_v30 }
 0x3dc   : > { %v1619_v37 = vpop.f32.mrf.mxu2  ;;  %v1638_v43 = vpop.f32.mrf.mxu3  ;;  %v1679_v16 = vadd.f32 %v1673_v3, %v1671_v19 }
 0x3dd   : > { %v1620_v55 = vadd.f32 %v1619_v37, %v1581_v8  ;;  %v1639_v1 = vadd.f32 %v1638_v43, %v1581_v8  ;;  %v1688_v8 = vadd.f32 %v1674_v23, %v1672_v48 }
 0x3df   : > { %v1647_v63 = vmax.f32 %v1620_v55, 0.0  ;;  %v1648_v0 = vmax.f32 %v1639_v1, 0.0 }
 0x3e1   : > { %v1741_v4 = vmul.f32 %v1731_v49, %v1647_v63  ;;  %v1742_v22 = vmul.f32 %v1731_v49, %v1648_v0  ;;  %v1800_v26 = vmul.f32 %v1790_v62, %v1647_v63  ;;  %v1801_v28 = vmul.f32 %v1790_v62, %v1648_v0 }
 0x3e2   : > { %v1675_v10 = vmul.f32 %v1664_v34, %v1647_v63  ;;  %v1676_v9 = vmul.f32 %v1664_v34, %v1648_v0 }
 0x3e3   : > { %v1746_v57 = vadd.f32 %v1745_v29, %v1741_v4  ;;  %v1755_v6 = vadd.f32 %v1754_v50, %v1742_v22  ;;  %v1805_v49 = vadd.f32 %v1804_v31, %v1800_v26  ;;  %v1814_v7 = vadd.f32 %v1813_v40, %v1801_v28 }
 0x3e4   : > { %v1621_v45 = vpop.f32.mrf.mxu2  ;;  %v1640_v15 = vpop.f32.mrf.mxu3  ;;  %v1689_v39 = vadd.f32 %v1688_v8, %v1676_v9 }
 0x3e5   : > { %v1622_v24 = vadd.f32 %v1621_v45, %v1586_v21  ;;  %v1641_v12 = vadd.f32 %v1640_v15, %v1586_v21  ;;  %v1680_v21 = vadd.f32 %v1679_v16, %v1675_v10  ;;  %v1700_v16 = vpop.permute.xlu1 %1699 }
 0x3e7   : > { %v1649_v56 = vmax.f32 %v1622_v24, 0.0  ;;  %v1650_v38 = vmax.f32 %v1641_v12, 0.0 }
 0x3e9   : > { %v1743_v32 = vmul.f32 %v2846_v47, %v1649_v56  ;;  %v1802_v35 = vmul.f32 %v1794_v36, %v1649_v56  ;;  %v1744_v2 = vmul.f32 %v2846_v47, %v1650_v38  ;;  %v1803_v33 = vmul.f32 %v1794_v36, %v1650_v38 }
 0x3ea   : > { %v1677_v18 = vmul.f32 %v1669_v17, %v1649_v56  ;;  %v1678_v41 = vmul.f32 %v1669_v17, %v1650_v38 }
 0x3eb   : > { %v1747_v37 = vadd.f32 %v1746_v57, %v1743_v32  ;;  %v1806_v43 = vadd.f32 %v1805_v49, %v1802_v35  ;;  %v1756_v44 = vadd.f32 %v1755_v6, %v1744_v2  ;;  %v1815_v42 = vadd.f32 %v1814_v7, %v1803_v33 }
 0x3ec   : > { %v1681_v55 = vadd.f32 %v1680_v21, %v1677_v18  ;;  %v1690_v1 = vadd.f32 %v1689_v39, %v1678_v41  ;;  %v1716_v39 = vlaneseq }
 0x3ed   : > { %v1748_v62 = vrot.slane %v1747_v37, 4  ;;  %v1807_v13 = vrot.slane %v1806_v43, 4  ;;  %v1757_v14 = vrot.slane %v1756_v44, 4  ;;  %v1816_v63 = vrot.slane %v1815_v42, 4 }
 0x3ee   : > { %v1682_v0 = vrot.slane %v1681_v55, 4  ;;  %v1691_v25 = vrot.slane %v1690_v1, 4  ;;  %vm2860_vm2 = vcmp.lt.s32.totalorder %v1716_v39, 256 }
 0x3ef   : > { %v1749_v27 = vadd.f32 %v1748_v62, %v1747_v37  ;;  %v1808_v5 = vadd.f32 %v1807_v13, %v1806_v43  ;;  %v1758_v47 = vadd.f32 %v1757_v14, %v1756_v44  ;;  %v1817_v36 = vadd.f32 %v1816_v63, %v1815_v42 }
 0x3f0   : > { %v1683_v61 = vadd.f32 %v1682_v0, %v1681_v55  ;;  %v1692_v30 = vadd.f32 %v1691_v25, %v1690_v1 }
 0x3f1   : > { %v1750_v20 = vrot.slane %v1749_v27, 2  ;;  %v1809_v60 = vrot.slane %v1808_v5, 2  ;;  %v1759_v11 = vrot.slane %v1758_v47, 2  ;;  %v1818_v19 = vrot.slane %v1817_v36, 2 }
 0x3f2   : > { %v1684_v48 = vrot.slane %v1683_v61, 2  ;;  %v1693_v3 = vrot.slane %v1692_v30, 2 }
 0x3f3   : > { %v1751_v23 = vadd.f32 %v1750_v20, %v1749_v27  ;;  %v1810_v34 = vadd.f32 %v1809_v60, %v1808_v5  ;;  %v1760_v4 = vadd.f32 %v1759_v11, %v1758_v47  ;;  %v1819_v22 = vadd.f32 %v1818_v19, %v1817_v36 }
 0x3f4   : > { %v1685_v26 = vadd.f32 %v1684_v48, %v1683_v61  ;;  %v1694_v28 = vadd.f32 %v1693_v3, %v1692_v30 }
 0x3f5   : > { %v1752_v45 = vrot.slane %v1751_v23, 1  ;;  %v1761_v15 = vrot.slane %v1760_v4, 1  ;;  %v1811_v31 = vrot.slane %v1810_v34, 1  ;;  %v1820_v12 = vrot.slane %v1819_v22, 1 }
 0x3f6   : > { %v1686_v40 = vrot.slane %v1685_v26, 1  ;;  %v1695_v24 = vrot.slane %v1694_v28, 1 }
 0x3f7   : > { %v1753_v29 = vadd.f32 %v1752_v45, %v1751_v23  ;;  %v1762_v50 = vadd.f32 %v1761_v15, %v1760_v4  ;;  %v1812_v38 = vadd.f32 %v1811_v31, %v1810_v34  ;;  %v1821_v6 = vadd.f32 %v1820_v12, %v1819_v22 }
 0x3f8   : > { %v1687_v10 = vadd.f32 %v1686_v40, %v1685_v26  ;;  %v1696_v9 = vadd.f32 %v1695_v24, %v1694_v28 }
 0x3f9   : > { %v1763_v8 = vadd.f32 %v1753_v29, %v1700_v16  ;;  %v1764_v56 = vadd.f32 %v1762_v50, %v1700_v16  ;;  %v1822_v21 = vadd.f32 %v1812_v38, %v1700_v16  ;;  %v1823_v37 = vadd.f32 %v1821_v6, %v1700_v16 }
 0x3fa   : > { %v1702_v17 = vadd.f32 %v1700_v16, %v1687_v10  ;;  %v1703_v57 = vadd.f32 %v1700_v16, %v1696_v9 }
 0x3fb   : > { %v1765_v49 = vadd.f32 %v1763_v8, %v740_v51  ;;  %v1766_v7 = vadd.f32 %v1764_v56, %v741_v52  ;;  %v1824_v52 = vadd.f32 %v1822_v21, %v874_v58  ;;  %v1825_v55 = vadd.f32 %v1823_v37, %v875_v59 }
 0x3fc   : > { %v1704_v32 = vadd.f32 %v1702_v17, %v638_v53  ;;  %v1705_v35 = vadd.f32 %v1703_v57, %v639_v54 }
 0x3fd   : > { %v1767_v2 = vmax.f32 %v1765_v49, 0.0  ;;  %v1768_v33 = vmax.f32 %v1766_v7, 0.0  ;;  %v1826_v58 = vmax.f32 %v1824_v52, 0.0  ;;  %v1827_v62 = vmax.f32 %v1825_v55, 0.0 }
 0x3fe   : > { %v1706_v18 = vmax.f32 %v1704_v32, 0.0  ;;  %v1707_v41 = vmax.f32 %v1705_v35, 0.0 }
 0x3ff   : > { %v1769_v43 = vmin.f32 %v1767_v2, 1.0  ;;  %v1770_v44 = vmin.f32 %v1768_v33, 1.0  ;;  %v1828_v14 = vmin.f32 %v1826_v58, 1.0  ;;  %v1829_v63 = vmin.f32 %v1827_v62, 1.0 }
 0x400   : > { %v1709_v51 = vmin.f32 %v1707_v41, 1.0  ;;  %v1708_v54 = vmin.f32 %v1706_v18, 1.0 }
 0x401   : > { %1773 = vst [vmem:[#allocation1] sm:$0xff] %v1769_v43 }
 0x402   : > { %v1712_v42 = vrot.slane %v1709_v51, 7  ;;  %1774 = vst [vmem:[#allocation1 + $0x9] sm:$0xff] %v1770_v44 }
 0x404   : > { %v1714_v1 = vsel %vm1713_vm1, %v1708_v54, %v1712_v42 }
 0x405   : > { %1720 = vst.msk [vmem:[%s504_s28] ss:$4 sm:$0x3] %vm2860_vm2, %v1714_v1 }
 0x409   : > { %v1776_v13 = vld [vmem:[#allocation1 + $0x1] ss:$9 sm:$0xff] }
 0x40a   : > { %2051 = vst.msk [vmem:[%s504_s28 + $0x1] ss:$4 sm:$0x3] %vm2860_vm2, %v1776_v13 }
 0x40b   : > { %1832 = vst [vmem:[#allocation1] sm:$0xff] %v1828_v14 }
 0x40c   : > { %1833 = vst [vmem:[#allocation1 + $0x9] sm:$0xff] %v1829_v63 }
 0x413   : > { %v1835_v0 = vld [vmem:[#allocation1 + $0x2] ss:$9 sm:$0xff] }
 0x414   : > { %2052 = vst.msk [vmem:[%s504_s28 + $0x2] ss:$4 sm:$0x3] %vm2860_vm2, %v1835_v0 }
 0x415 PF: > { %s21_s19 = sadd.s32 1, %s2177_s19   ;;  %s2900_s17 = smov %s2173_s18 }
 0x416   : > { %p18_p5 = scmp.ge.s32.totalorder %s21_s19, 4   ;;  %s2901_s18 = smov %s2903_s20 }
 0x418   :  { %20 = sbr.rel (!%p18_p5) target bundleno = 2 (0x2), region = 110 }

</bundles_post_ra>
